<compile_context>
chip_gen: v5e
topology: v5e:2x2
jax: 0.10.0
libtpu: 0.0.40
codegen_flags: <defaults>
</compile_context>

<pallas_src>
import functools

import jax
import jax.numpy as jnp
from jax.experimental import pallas as pl
from jax.experimental.pallas import tpu as pltpu


_VMEM_LIMIT = 32 * 1024 * 1024  # safe on v5e/v6e/v7x; tiles below are well under this


# ------------------------------------------------------------------
# helpers
# ------------------------------------------------------------------

def _round_up(x, m):
    return ((x + m - 1) // m) * m


def _pick_tile(dim, target, aligns):
    """Largest tile <= target dividing dim, preferring the first (largest) alignment;
    falls back to the full dim (always a legal BlockSpec)."""
    if dim <= target:
        return dim
    for align in aligns:
        t = (target // align) * align
        while t >= align:
            if dim % t == 0:
                return t
            t -= align
    return dim


def _pick_heads_per_block(num_heads, head_dim, max_lanes=512):
    """Heads per attention grid step: prefer lane-dense (multiple of 128) blocks."""
    for hpb in range(num_heads, 0, -1):
        if (num_heads % hpb == 0 and (hpb * head_dim) % 128 == 0
                and hpb * head_dim <= max_lanes):
            return hpb
    return num_heads  # fallback: all heads in one block (full-width path)


# ------------------------------------------------------------------
# fused (LN ->) matmul (-> bias -> quick_gelu -> +residual) kernels
# ------------------------------------------------------------------

def _mm_fullk_kernel(x_ref, *rest, has_ln, has_bias, has_residual, activation, ln_eps):
    """Single K step (full K in one block).  Optional LN prologue cached in a bf16 scratch
    at j==0 and reused across all output column blocks."""
    i = 0
    if has_ln:
        g_ref, beta_ref = rest[i], rest[i + 1]
        i += 2
    w_ref = rest[i]; i += 1
    b_ref = None
    if has_bias:
        b_ref = rest[i]; i += 1
    res_ref = None
    if has_residual:
        res_ref = rest[i]; i += 1
    o_ref = rest[i]; i += 1

    if has_ln:
        xb_ref = rest[i]  # (tm, K) bf16 scratch

        @pl.when(pl.program_id(1) == 0)
        def _():
            x = x_ref[...].astype(jnp.float32)
            mean = jnp.mean(x, axis=-1, keepdims=True)
            var = jnp.mean((x - mean) ** 2, axis=-1, keepdims=True)
            xn = (x - mean) * jax.lax.rsqrt(var + ln_eps)
            xn = xn * g_ref[...].astype(jnp.float32) + beta_ref[...].astype(jnp.float32)
            xb_ref[...] = xn.astype(jnp.bfloat16)

        lhs = xb_ref[...]
    else:
        lhs = x_ref[...].astype(jnp.bfloat16)

    acc = jnp.dot(lhs, w_ref[...].astype(jnp.bfloat16),
                  preferred_element_type=jnp.float32)
    if has_bias:
        acc = acc + b_ref[...].astype(jnp.float32)
    if activation == "quick_gelu":
        acc = acc * jax.nn.sigmoid(1.702 * acc)
    if has_residual:
        acc = acc + res_ref[...].astype(jnp.float32)
    o_ref[...] = acc.astype(o_ref.dtype)


def _mm_ksplit_kernel(x_ref, w_ref, *rest, has_bias, has_residual, activation):
    """K split across the grid: f32 VMEM accumulator with init/finalize on the K axis."""
    i = 0
    b_ref = None
    if has_bias:
        b_ref = rest[i]; i += 1
    res_ref = None
    if has_residual:
        res_ref = rest[i]; i += 1
    o_ref = rest[i]
    acc_ref = rest[i + 1]

    kk = pl.program_id(2)
    nk = pl.num_programs(2)

    @pl.when(kk == 0)
    def _():
        acc_ref[...] = jnp.zeros_like(acc_ref)

    acc_ref[...] += jnp.dot(x_ref[...].astype(jnp.bfloat16),
                            w_ref[...].astype(jnp.bfloat16),
                            preferred_element_type=jnp.float32)

    @pl.when(kk == nk - 1)
    def _():
        acc = acc_ref[...]
        if has_bias:
            acc = acc + b_ref[...].astype(jnp.float32)
        if activation == "quick_gelu":
            acc = acc * jax.nn.sigmoid(1.702 * acc)
        if has_residual:
            acc = acc + res_ref[...].astype(jnp.float32)
        o_ref[...] = acc.astype(o_ref.dtype)


def fused_matmul(x, w, b=None, ln=None, residual=None, activation=None,
                 out_dtype=jnp.float32, ln_eps=1e-5, tm=256, tn=512, tk=512):
    """o = act(LN_opt(x) @ w + b) + residual_opt.  x:[M,K], w:[K,N] (bf16 ok), b:[N]."""
    M, K = x.shape
    K2, N = w.shape
    assert K == K2
    has_ln = ln is not None
    has_bias = b is not None
    has_res = residual is not None

    tm = _pick_tile(M, tm, (8,))
    tn = _pick_tile(N, tn, (256, 128))
    tk_eff = K if has_ln else _pick_tile(K, tk, (256, 128))
    nk = K // tk_eff

    bytes_accessed = int(M * K * x.dtype.itemsize + K * N * w.dtype.itemsize
                         + M * N * jnp.dtype(out_dtype).itemsize
                         + (M * N * residual.dtype.itemsize if has_res else 0)
                         + (N * 4 if has_bias else 0))
    cost = pl.CostEstimate(
        flops=int(2 * M * N * K),
        transcendentals=int(M * N if activation == "quick_gelu" else 0),
        bytes_accessed=bytes_accessed)

    if has_ln or nk == 1:
        # full-K path, 2D grid; LN (if any) cached at j==0 into a bf16 scratch
        grid = (M // tm, N // tn)
        in_specs = [pl.BlockSpec((tm, K), lambda i, j: (i, 0))]
        args = [x]
        if has_ln:
            g, beta = ln
            in_specs += [pl.BlockSpec((1, K), lambda i, j: (0, 0)),
                         pl.BlockSpec((1, K), lambda i, j: (0, 0))]
            args += [g.reshape(1, K), beta.reshape(1, K)]
        in_specs.append(pl.BlockSpec((K, tn), lambda i, j: (0, j)))
        args.append(w)
        if has_bias:
            in_specs.append(pl.BlockSpec((1, tn), lambda i, j: (0, j)))
            args.append(b.reshape(1, N))
        if has_res:
            in_specs.append(pl.BlockSpec((tm, tn), lambda i, j: (i, j)))
            args.append(residual)
        out_specs = pl.BlockSpec((tm, tn), lambda i, j: (i, j))
        scratch = [pltpu.VMEM((tm, K), jnp.bfloat16)] if has_ln else []
        kernel = functools.partial(_mm_fullk_kernel, has_ln=has_ln,
                                   has_bias=has_bias, has_residual=has_res,
                                   activation=activation, ln_eps=ln_eps)
        # j must stay in-order on one core so the j==0 LN cache is always valid
        dims = ("parallel", "arbitrary") if has_ln else ("parallel", "parallel")
    else:
        grid = (M // tm, N // tn, nk)
        in_specs = [pl.BlockSpec((tm, tk_eff), lambda i, j, k: (i, k)),
                    pl.BlockSpec((tk_eff, tn), lambda i, j, k: (k, j))]
        args = [x, w]
        if has_bias:
            in_specs.append(pl.BlockSpec((1, tn), lambda i, j, k: (0, j)))
            args.append(b.reshape(1, N))
        if has_res:
            in_specs.append(pl.BlockSpec((tm, tn), lambda i, j, k: (i, j)))
            args.append(residual)
        out_specs = pl.BlockSpec((tm, tn), lambda i, j, k: (i, j))
        scratch = [pltpu.VMEM((tm, tn), jnp.float32)]
        kernel = functools.partial(_mm_ksplit_kernel, has_bias=has_bias,
                                   has_residual=has_res, activation=activation)
        dims = ("parallel", "parallel", "arbitrary")

    return pl.pallas_call(
        kernel,
        grid=grid,
        out_shape=jax.ShapeDtypeStruct((M, N), out_dtype),
        in_specs=in_specs,
        out_specs=out_specs,
        scratch_shapes=scratch,
        compiler_params=pltpu.CompilerParams(
            dimension_semantics=dims, vmem_limit_bytes=_VMEM_LIMIT),
        cost_estimate=cost,
    )(*args)


# ------------------------------------------------------------------
# standalone LayerNorm (used once, for pre_layernorm) — tiled over rows
# ------------------------------------------------------------------

def _layernorm_kernel(x_ref, g_ref, b_ref, o_ref, *, eps):
    x = x_ref[...].astype(jnp.float32)
    mean = jnp.mean(x, axis=-1, keepdims=True)
    var = jnp.mean((x - mean) ** 2, axis=-1, keepdims=True)
    y = (x - mean) * jax.lax.rsqrt(var + eps)
    o_ref[...] = (y * g_ref[...] + b_ref[...]).astype(o_ref.dtype)


def layernorm(x, g, b, eps=1e-5, tm=256):
    M, D = x.shape
    tm = _pick_tile(M, tm, (8,))
    return pl.pallas_call(
        functools.partial(_layernorm_kernel, eps=eps),
        grid=(M // tm,),
        out_shape=jax.ShapeDtypeStruct((M, D), jnp.float32),
        in_specs=[pl.BlockSpec((tm, D), lambda i: (i, 0)),
                  pl.BlockSpec((1, D), lambda i: (0, 0)),
                  pl.BlockSpec((1, D), lambda i: (0, 0))],
        out_specs=pl.BlockSpec((tm, D), lambda i: (i, 0)),
        compiler_params=pltpu.CompilerParams(
            dimension_semantics=("parallel",), vmem_limit_bytes=_VMEM_LIMIT),
    )(x, g.reshape(1, D), b.reshape(1, D))


# ------------------------------------------------------------------
# multi-head attention on a flat [B, S_pad, 3*D] qkv (scale pre-folded into q weights)
# ------------------------------------------------------------------

def _attn_one_head(q, k, v, s_valid):
    """q,k,v: (S, Dh).  Softmax over keys with padded keys (>= s_valid) masked out."""
    S = q.shape[0]
    qb = q.astype(jnp.bfloat16)
    kb = k.astype(jnp.bfloat16)
    vb = v.astype(jnp.bfloat16)
    s = jax.lax.dot_general(qb, kb, (((1,), (1,)), ((), ())),
                            preferred_element_type=jnp.float32)        # (S, S)
    if s_valid < S:
        col = jax.lax.broadcasted_iota(jnp.int32, (S, S), 1)
        s = jnp.where(col < s_valid, s, -1e30)
    s = s - jnp.max(s, axis=-1, keepdims=True)
    p = jnp.exp(s)
    p = p * pl.reciprocal(jnp.sum(p, axis=-1, keepdims=True), approx=True)
    return jnp.dot(p.astype(jnp.bfloat16), vb, preferred_element_type=jnp.float32)


def _attn_kernel_split(q_ref, k_ref, v_ref, o_ref, *, hpb, head_dim, s_valid):
    # q/k/v refs: (1, S, hpb*Dh) lane-dense blocks of the same flat qkv array
    for h in range(hpb):
        sl = slice(h * head_dim, (h + 1) * head_dim)
        out = _attn_one_head(q_ref[0, :, sl], k_ref[0, :, sl], v_ref[0, :, sl], s_valid)
        o_ref[0, :, sl] = out.astype(o_ref.dtype)       # direct per-head lane-slice store


def _attn_kernel_full(qkv_ref, o_ref, *, num_heads, head_dim, hidden, s_valid):
    # qkv_ref: (1, S, 3*D) full block; q|k|v contiguous along lanes
    for h in range(num_heads):
        lo = h * head_dim
        hi = lo + head_dim
        out = _attn_one_head(qkv_ref[0, :, lo:hi],
                             qkv_ref[0, :, hidden + lo:hidden + hi],
                             qkv_ref[0, :, 2 * hidden + lo:2 * hidden + hi],
                             s_valid)
        o_ref[0, :, lo:hi] = out.astype(o_ref.dtype)


def attention(qkv, num_heads, head_dim, s_valid, out_dtype=jnp.bfloat16):
    """qkv: [B, S_pad, 3*D] (q|k|v contiguous, heads contiguous within each) -> [B, S_pad, D]."""
    B, S, threeD = qkv.shape
    D = threeD // 3
    hpb = _pick_heads_per_block(num_heads, head_dim)
    lanes = hpb * head_dim
    cost = pl.CostEstimate(
        flops=int(4 * B * num_heads * S * S * head_dim),
        transcendentals=int(B * num_heads * S * S),
        bytes_accessed=int(qkv.size * qkv.dtype.itemsize
                           + B * S * D * jnp.dtype(out_dtype).itemsize))
    cp = pltpu.CompilerParams(dimension_semantics=("parallel", "parallel"),
                              vmem_limit_bytes=_VMEM_LIMIT)

    if lanes % 128 == 0:
        nhb = num_heads // hpb  # head-blocks; also = D // lanes
        kernel = functools.partial(_attn_kernel_split, hpb=hpb,
                                   head_dim=head_dim, s_valid=s_valid)
        return pl.pallas_call(
            kernel,
            grid=(B, nhb),
            out_shape=jax.ShapeDtypeStruct((B, S, D), out_dtype),
            in_specs=[pl.BlockSpec((1, S, lanes), lambda b, h: (b, 0, h)),
                      pl.BlockSpec((1, S, lanes), lambda b, h: (b, 0, h + nhb)),
                      pl.BlockSpec((1, S, lanes), lambda b, h: (b, 0, h + 2 * nhb))],
            out_specs=pl.BlockSpec((1, S, lanes), lambda b, h: (b, 0, h)),
            compiler_params=cp,
            cost_estimate=cost,
        )(qkv, qkv, qkv)

    # small-dim fallback: whole qkv row block (full last dim keeps the BlockSpec legal)
    kernel = functools.partial(_attn_kernel_full, num_heads=num_heads,
                               head_dim=head_dim, hidden=D, s_valid=s_valid)
    return pl.pallas_call(
        kernel,
        grid=(B,),
        out_shape=jax.ShapeDtypeStruct((B, S, D), out_dtype),
        in_specs=[pl.BlockSpec((1, S, threeD), lambda b: (b, 0, 0))],
        out_specs=pl.BlockSpec((1, S, D), lambda b: (b, 0, 0)),
        compiler_params=pltpu.CompilerParams(dimension_semantics=("parallel",),
                                             vmem_limit_bytes=_VMEM_LIMIT),
        cost_estimate=cost,
    )(qkv)


# ------------------------------------------------------------------
# Model glue (plain JAX: reshapes / one-time padding / parameter plumbing only)
# ------------------------------------------------------------------

def init_params(key, cfg):
    D = cfg["hidden"]
    C = cfg["channels"]
    P = cfg["patch_size"]
    I = cfg["intermediate"]
    L = cfg["num_layers"]
    NH = cfg["num_heads"]
    Dh = D // NH
    S = (cfg["image_size"] // P) ** 2 + 1
    scale = Dh ** -0.5

    def init(k, shape, s=0.02):
        return s * jax.random.normal(k, shape, jnp.float32)

    ks = iter(jax.random.split(key, 3 + 6 * L))
    conv_w = init(next(ks), (D, C, P, P))              # Conv2d weight [out, in, kh, kw]
    params = {
        # pre-lowered to an unfold-matmul weight [C*P*P, D]; stored bf16 in HBM
        "patch_embed_w": conv_w.reshape(D, C * P * P).T.astype(jnp.bfloat16),
        "class_embedding": init(next(ks), (D,)),
        "position_embedding": init(next(ks), (S, D)),
        "pre_ln_g": jnp.ones((D,), jnp.float32),
        "pre_ln_b": jnp.zeros((D,), jnp.float32),
        "layers": [],
    }
    for _ in range(L):
        qw = init(next(ks), (D, D))
        kw = init(next(ks), (D, D))
        vw = init(next(ks), (D, D))
        qb = jnp.zeros((D,), jnp.float32)
        kb = jnp.zeros((D,), jnp.float32)
        vb = jnp.zeros((D,), jnp.float32)
        lyr = {
            "ln1_g": jnp.ones((D,), jnp.float32), "ln1_b": jnp.zeros((D,), jnp.float32),
            # fused QKV projection [D, 3D] bf16; 1/sqrt(Dh) folded into the q columns/bias
            "qkv_w": jnp.concatenate([qw * scale, kw, vw], axis=1).astype(jnp.bfloat16),
            "qkv_b": jnp.concatenate([qb * scale, kb, vb], axis=0),
            "o_w": init(next(ks), (D, D)).astype(jnp.bfloat16),
            "o_b": jnp.zeros((D,), jnp.float32),
            "ln2_g": jnp.ones((D,), jnp.float32), "ln2_b": jnp.zeros((D,), jnp.float32),
            "fc1_w": init(next(ks), (D, I)).astype(jnp.bfloat16),
            "fc1_b": jnp.zeros((I,), jnp.float32),
            "fc2_w": init(next(ks), (I, D)).astype(jnp.bfloat16),
            "fc2_b": jnp.zeros((D,), jnp.float32),
        }
        params["layers"].append(lyr)
    return params


def clip_img_feat(pixel_values, params, cfg):
    # layout: pixel_values is NCHW [B, C, H, W] (PyTorch Conv2d convention)
    B, C, H, W = pixel_values.shape
    P = cfg["patch_size"]
    D = cfg["hidden"]
    NH = cfg["num_heads"]
    Dh = D // NH
    nH, nW = H // P, W // P
    nP = nH * nW
    S = nP + 1
    # pad the sequence to a tileable length; padded keys are masked in attention
    S_pad = _round_up(S, 128 if S > 64 else 8)

    # --- patch embedding: Conv2d(k=P, s=P, bias=False) lowered to unfold + matmul ---
    x = pixel_values.reshape(B, C, nH, P, nW, P)
    x = x.transpose(0, 2, 4, 1, 3, 5).reshape(B * nP, C * P * P)   # (C, ph, pw) order
    patch = fused_matmul(x, params["patch_embed_w"])               # no bias in CLIP conv
    patch = patch.reshape(B, nP, D)

    # --- prepend CLS, add position embeddings, pad sequence with zero rows ---
    # TODO(synk): CLS-concat + pos-emb add + zero-padding kept in plain JAX (one-time, tiny).
    cls = jnp.broadcast_to(params["class_embedding"].reshape(1, 1, D), (B, 1, D))
    h = jnp.concatenate([cls, patch], axis=1) + params["position_embedding"][None]
    if S_pad > S:
        h = jnp.pad(h, ((0, 0), (0, S_pad - S), (0, 0)))

    # pre_layernorm (output is the f32 residual stream entering layer 0)
    h = layernorm(h.reshape(B * S_pad, D), params["pre_ln_g"], params["pre_ln_b"])

    for lyr in params["layers"]:
        # --- attention block: LN1 fused into the QKV matmul, residual fused into o_proj ---
        qkv = fused_matmul(h, lyr["qkv_w"], lyr["qkv_b"],
                           ln=(lyr["ln1_g"], lyr["ln1_b"]),
                           out_dtype=jnp.bfloat16)                 # [B*S_pad, 3D] bf16
        attn = attention(qkv.reshape(B, S_pad, 3 * D), NH, Dh, s_valid=S,
                         out_dtype=jnp.bfloat16)                   # [B, S_pad, D] bf16
        h = fused_matmul(attn.reshape(B * S_pad, D), lyr["o_w"], lyr["o_b"],
                         residual=h)                               # f32 residual stream

        # --- MLP block: LN2 fused into fc1 (+quick_gelu), residual fused into fc2 ---
        m = fused_matmul(h, lyr["fc1_w"], lyr["fc1_b"],
                         ln=(lyr["ln2_g"], lyr["ln2_b"]),
                         activation="quick_gelu", out_dtype=jnp.bfloat16)
        h = fused_matmul(m, lyr["fc2_w"], lyr["fc2_b"], residual=h)

    last_hidden = h.reshape(B, S_pad, D)
    # last_hidden_state[:, 0]: CLS token (row 0 is always a real token), no post_layernorm
    return last_hidden[:, 0]


# ------------------------------------------------------------------
# main
# ------------------------------------------------------------------

if __name__ == "__main__":
    # small, ViT-shaped config (real chinese-clip-vit-base-patch16: D=768, L=12, heads=12, img=224)
    cfg = {
        "image_size": 32,
        "patch_size": 16,
        "channels": 3,
        "hidden": 32,
        "num_heads": 4,
        "intermediate": 128,
        "num_layers": 2,
    }

    key = jax.random.PRNGKey(0)
    k_img, k_params = jax.random.split(key)
    img = jax.random.normal(
        k_img, (2, cfg["channels"], cfg["image_size"], cfg["image_size"]), jnp.float32
    )  # NCHW, like the PyTorch module input
    params = init_params(k_params, cfg)

    # TODO(synk): weights are synthetic (deterministic PRNG), not the pretrained
    # 'OFA-Sys/chinese-clip-vit-base-patch16' checkpoint.
    fwd = jax.jit(functools.partial(clip_img_feat, cfg=cfg))
    feat = jax.block_until_ready(fwd(img, params))

    assert feat.shape == (2, cfg["hidden"])
    assert jnp.all(jnp.isfinite(feat))
    print("KERNEL_OK")
</pallas_src>

<mosaic_0001>
module attributes {stable_mosaic.version = 11 : i64} {
  func.func @_mm_ksplit_kernel(%arg0: i32, %arg1: i32, %arg2: i32, %arg3: memref<8x256xf32, #tpu.memory_space<vmem>>, %arg4: memref<256x32xbf16, #tpu.memory_space<vmem>>, %arg5: memref<8x32xf32, #tpu.memory_space<vmem>>, %arg6: memref<8x32xf32, #tpu.memory_space<vmem>>) attributes {dimension_semantics = [#tpu.dimension_semantics<parallel>, #tpu.dimension_semantics<parallel>, #tpu.dimension_semantics<arbitrary>], iteration_bounds = array<i64: 1, 1, 3>, scalar_prefetch = 0 : i64, scratch_operands = 1 : i64, tpu.core_type = #tpu.core_type<tc>, window_params = [{transform_indices = @transform_0, window_bounds = array<i64: 8, 256>}, {transform_indices = @transform_1, window_bounds = array<i64: 256, 32>}, {transform_indices = @transform_2, window_bounds = array<i64: 8, 32>}]} {
    %c0_i32 = arith.constant 0 : i32
    %0 = arith.cmpi eq, %arg2, %c0_i32 : i32
    %1 = arith.extui %0 : i1 to i32
    %c0_i32_0 = arith.constant 0 : i32
    %2 = arith.cmpi ne, %1, %c0_i32_0 : i32
    scf.if %2 {
      %cst_9 = arith.constant 0.000000e+00 : f32
      %13 = vector.broadcast %cst_9 : f32 to vector<8x32xf32>
      %c0_10 = arith.constant 0 : index
      %c0_11 = arith.constant 0 : index
      %14 = vector.load %arg6[%c0_10, %c0_11] : memref<8x32xf32, #tpu.memory_space<vmem>>, vector<8x32xf32>
      tpu.vector_store %arg6[%c0_10, %c0_11], %13 {strides = array<i32>} : memref<8x32xf32, #tpu.memory_space<vmem>>, vector<8x32xf32>,
    } else {
    }
    %c0 = arith.constant 0 : index
    %c0_1 = arith.constant 0 : index
    %3 = vector.load %arg6[%c0, %c0_1] : memref<8x32xf32, #tpu.memory_space<vmem>>, vector<8x32xf32>
    %c0_2 = arith.constant 0 : index
    %c0_3 = arith.constant 0 : index
    %4 = vector.load %arg3[%c0_2, %c0_3] : memref<8x256xf32, #tpu.memory_space<vmem>>, vector<8x256xf32>
    %5 = arith.truncf %4 : vector<8x256xf32> to vector<8x256xbf16>
    %c0_4 = arith.constant 0 : index
    %c0_5 = arith.constant 0 : index
    %6 = vector.load %arg4[%c0_4, %c0_5] : memref<256x32xbf16, #tpu.memory_space<vmem>>, vector<256x32xbf16>
    %cst = arith.constant dense<0.000000e+00> : vector<8x32xf32>
    %7 = tpu.matmul %5, %6, %cst {dimension_numbers = #tpu.dot_dimension_numbers<[1], [0], [0], [1], [0, 0, 1, 1], [], []>} : vector<8x256xbf16>, vector<256x32xbf16>, vector<8x32xf32> -> vector<8x32xf32>
    %8 = arith.addf %3, %7 : vector<8x32xf32>
    %c0_6 = arith.constant 0 : index
    %c0_7 = arith.constant 0 : index
    %9 = vector.load %arg6[%c0_6, %c0_7] : memref<8x32xf32, #tpu.memory_space<vmem>>, vector<8x32xf32>
    tpu.vector_store %arg6[%c0_6, %c0_7], %8 {strides = array<i32>} : memref<8x32xf32, #tpu.memory_space<vmem>>, vector<8x32xf32>,
    %c2_i32 = arith.constant 2 : i32
    %10 = arith.cmpi eq, %arg2, %c2_i32 : i32
    %11 = arith.extui %10 : i1 to i32
    %c0_i32_8 = arith.constant 0 : i32
    %12 = arith.cmpi ne, %11, %c0_i32_8 : i32
    scf.if %12 {
      %c0_9 = arith.constant 0 : index
      %c0_10 = arith.constant 0 : index
      %13 = vector.load %arg6[%c0_9, %c0_10] : memref<8x32xf32, #tpu.memory_space<vmem>>, vector<8x32xf32>
      %c0_11 = arith.constant 0 : index
      %c0_12 = arith.constant 0 : index
      %14 = vector.load %arg5[%c0_11, %c0_12] : memref<8x32xf32, #tpu.memory_space<vmem>>, vector<8x32xf32>
      tpu.vector_store %arg5[%c0_11, %c0_12], %13 {strides = array<i32>} : memref<8x32xf32, #tpu.memory_space<vmem>>, vector<8x32xf32>,
    } else {
    }
    return
  }
  func.func @transform_0(%arg0: i32, %arg1: i32, %arg2: i32) -> (i32, i32) {
    %c0_i32 = arith.constant 0 : i32
    return %arg0, %arg2 : i32, i32
  }
  func.func @transform_1(%arg0: i32, %arg1: i32, %arg2: i32) -> (i32, i32) {
    %c0_i32 = arith.constant 0 : i32
    return %arg2, %arg1 : i32, i32
  }
  func.func @transform_2(%arg0: i32, %arg1: i32, %arg2: i32) -> (i32, i32) {
    %c0_i32 = arith.constant 0 : i32
    return %arg0, %arg1 : i32, i32
  }
}

module attributes {stable_mosaic.version = 11 : i64} {
  func.func @_layernorm_kernel(%arg0: i32, %arg1: memref<16x32xf32, #tpu.memory_space<vmem>>, %arg2: memref<1x32xf32, #tpu.memory_space<vmem>>, %arg3: memref<1x32xf32, #tpu.memory_space<vmem>>, %arg4: memref<16x32xf32, #tpu.memory_space<vmem>>) attributes {dimension_semantics = [#tpu.dimension_semantics<parallel>], iteration_bounds = array<i64: 1>, scalar_prefetch = 0 : i64, scratch_operands = 0 : i64, tpu.core_type = #tpu.core_type<tc>, window_params = [{transform_indices = @transform_0, window_bounds = array<i64: 16, 32>}, {pipeline_mode = #tpu.pipeline_mode<synchronous>, transform_indices = @transform_1, window_bounds = array<i64: 1, 32>}, {pipeline_mode = #tpu.pipeline_mode<synchronous>, transform_indices = @transform_2, window_bounds = array<i64: 1, 32>}, {transform_indices = @transform_3, window_bounds = array<i64: 16, 32>}]} {
    %c0 = arith.constant 0 : index
    %c0_0 = arith.constant 0 : index
    %0 = vector.load %arg1[%c0, %c0_0] : memref<16x32xf32, #tpu.memory_space<vmem>>, vector<16x32xf32>
    %cst = arith.constant dense<0.000000e+00> : vector<16xf32>
    %1 = vector.multi_reduction <add>, %0, %cst [1] : vector<16x32xf32> to vector<16xf32>
    %2 = vector.shape_cast %1 : vector<16xf32> to vector<16x1xf32>
    %cst_1 = arith.constant 3.200000e+01 : f32
    %3 = vector.broadcast %cst_1 : f32 to vector<16x1xf32>
    %4 = arith.divf %2, %3 : vector<16x1xf32>
    %5 = vector.broadcast %4 : vector<16x1xf32> to vector<16x32xf32>
    %6 = arith.subf %0, %5 : vector<16x32xf32>
    %7 = arith.mulf %6, %6 : vector<16x32xf32>
    %cst_2 = arith.constant dense<0.000000e+00> : vector<16xf32>
    %8 = vector.multi_reduction <add>, %7, %cst_2 [1] : vector<16x32xf32> to vector<16xf32>
    %9 = vector.shape_cast %8 : vector<16xf32> to vector<16x1xf32>
    %cst_3 = arith.constant 3.200000e+01 : f32
    %10 = vector.broadcast %cst_3 : f32 to vector<16x1xf32>
    %11 = arith.divf %9, %10 : vector<16x1xf32>
    %12 = vector.broadcast %4 : vector<16x1xf32> to vector<16x32xf32>
    %13 = arith.subf %0, %12 : vector<16x32xf32>
    %cst_4 = arith.constant 9.99999974E-6 : f32
    %14 = vector.broadcast %cst_4 : f32 to vector<16x1xf32>
    %15 = arith.addf %11, %14 : vector<16x1xf32>
    %16 = math.rsqrt %15 : vector<16x1xf32>
    %17 = vector.broadcast %16 : vector<16x1xf32> to vector<16x32xf32>
    %18 = arith.mulf %13, %17 : vector<16x32xf32>
    %c0_5 = arith.constant 0 : index
    %c0_6 = arith.constant 0 : index
    %19 = vector.load %arg2[%c0_5, %c0_6] : memref<1x32xf32, #tpu.memory_space<vmem>>, vector<1x32xf32>
    %20 = vector.broadcast %19 : vector<1x32xf32> to vector<16x32xf32>
    %21 = arith.mulf %18, %20 : vector<16x32xf32>
    %c0_7 = arith.constant 0 : index
    %c0_8 = arith.constant 0 : index
    %22 = vector.load %arg3[%c0_7, %c0_8] : memref<1x32xf32, #tpu.memory_space<vmem>>, vector<1x32xf32>
    %23 = vector.broadcast %22 : vector<1x32xf32> to vector<16x32xf32>
    %24 = arith.addf %21, %23 : vector<16x32xf32>
    %c0_9 = arith.constant 0 : index
    %c0_10 = arith.constant 0 : index
    %25 = vector.load %arg4[%c0_9, %c0_10] : memref<16x32xf32, #tpu.memory_space<vmem>>, vector<16x32xf32>
    tpu.vector_store %arg4[%c0_9, %c0_10], %24 {strides = array<i32>} : memref<16x32xf32, #tpu.memory_space<vmem>>, vector<16x32xf32>,
    return
  }
  func.func @transform_0(%arg0: i32) -> (i32, i32) {
    %c0_i32 = arith.constant 0 : i32
    %c0_i32_0 = arith.constant 0 : i32
    return %arg0, %c0_i32 : i32, i32
  }
  func.func @transform_1(%arg0: i32) -> (i32, i32) {
    %c0_i32 = arith.constant 0 : i32
    %c0_i32_0 = arith.constant 0 : i32
    %c0_i32_1 = arith.constant 0 : i32
    return %c0_i32, %c0_i32_0 : i32, i32
  }
  func.func @transform_2(%arg0: i32) -> (i32, i32) {
    %c0_i32 = arith.constant 0 : i32
    %c0_i32_0 = arith.constant 0 : i32
    %c0_i32_1 = arith.constant 0 : i32
    return %c0_i32, %c0_i32_0 : i32, i32
  }
  func.func @transform_3(%arg0: i32) -> (i32, i32) {
    %c0_i32 = arith.constant 0 : i32
    %c0_i32_0 = arith.constant 0 : i32
    return %arg0, %c0_i32 : i32, i32
  }
}

module attributes {stable_mosaic.version = 11 : i64} {
  func.func @_mm_fullk_kernel(%arg0: i32, %arg1: i32, %arg2: memref<16x32xf32, #tpu.memory_space<vmem>>, %arg3: memref<1x32xf32, #tpu.memory_space<vmem>>, %arg4: memref<1x32xf32, #tpu.memory_space<vmem>>, %arg5: memref<32x96xbf16, #tpu.memory_space<vmem>>, %arg6: memref<1x96xf32, #tpu.memory_space<vmem>>, %arg7: memref<16x96xbf16, #tpu.memory_space<vmem>>, %arg8: memref<16x32xbf16, #tpu.memory_space<vmem>>) attributes {dimension_semantics = [#tpu.dimension_semantics<parallel>, #tpu.dimension_semantics<arbitrary>], iteration_bounds = array<i64: 1, 1>, scalar_prefetch = 0 : i64, scratch_operands = 1 : i64, tpu.core_type = #tpu.core_type<tc>, window_params = [{transform_indices = @transform_0, window_bounds = array<i64: 16, 32>}, {pipeline_mode = #tpu.pipeline_mode<synchronous>, transform_indices = @transform_1, window_bounds = array<i64: 1, 32>}, {pipeline_mode = #tpu.pipeline_mode<synchronous>, transform_indices = @transform_2, window_bounds = array<i64: 1, 32>}, {transform_indices = @transform_3, window_bounds = array<i64: 32, 96>}, {transform_indices = @transform_4, window_bounds = array<i64: 1, 96>}, {transform_indices = @transform_5, window_bounds = array<i64: 16, 96>}]} {
    %c0_i32 = arith.constant 0 : i32
    %0 = arith.cmpi eq, %arg1, %c0_i32 : i32
    %1 = arith.extui %0 : i1 to i32
    %c0_i32_0 = arith.constant 0 : i32
    %2 = arith.cmpi ne, %1, %c0_i32_0 : i32
    scf.if %2 {
      %c0_8 = arith.constant 0 : index
      %c0_9 = arith.constant 0 : index
      %11 = vector.load %arg2[%c0_8, %c0_9] : memref<16x32xf32, #tpu.memory_space<vmem>>, vector<16x32xf32>
      %cst_10 = arith.constant dense<0.000000e+00> : vector<16xf32>
      %12 = vector.multi_reduction <add>, %11, %cst_10 [1] : vector<16x32xf32> to vector<16xf32>
      %13 = vector.shape_cast %12 : vector<16xf32> to vector<16x1xf32>
      %cst_11 = arith.constant 3.200000e+01 : f32
      %14 = vector.broadcast %cst_11 : f32 to vector<16x1xf32>
      %15 = arith.divf %13, %14 : vector<16x1xf32>
      %16 = vector.broadcast %15 : vector<16x1xf32> to vector<16x32xf32>
      %17 = arith.subf %11, %16 : vector<16x32xf32>
      %18 = arith.mulf %17, %17 : vector<16x32xf32>
      %cst_12 = arith.constant dense<0.000000e+00> : vector<16xf32>
      %19 = vector.multi_reduction <add>, %18, %cst_12 [1] : vector<16x32xf32> to vector<16xf32>
      %20 = vector.shape_cast %19 : vector<16xf32> to vector<16x1xf32>
      %cst_13 = arith.constant 3.200000e+01 : f32
      %21 = vector.broadcast %cst_13 : f32 to vector<16x1xf32>
      %22 = arith.divf %20, %21 : vector<16x1xf32>
      %23 = vector.broadcast %15 : vector<16x1xf32> to vector<16x32xf32>
      %24 = arith.subf %11, %23 : vector<16x32xf32>
      %cst_14 = arith.constant 9.99999974E-6 : f32
      %25 = vector.broadcast %cst_14 : f32 to vector<16x1xf32>
      %26 = arith.addf %22, %25 : vector<16x1xf32>
      %27 = math.rsqrt %26 : vector<16x1xf32>
      %28 = vector.broadcast %27 : vector<16x1xf32> to vector<16x32xf32>
      %29 = arith.mulf %24, %28 : vector<16x32xf32>
      %c0_15 = arith.constant 0 : index
      %c0_16 = arith.constant 0 : index
      %30 = vector.load %arg3[%c0_15, %c0_16] : memref<1x32xf32, #tpu.memory_space<vmem>>, vector<1x32xf32>
      %31 = vector.broadcast %30 : vector<1x32xf32> to vector<16x32xf32>
      %32 = arith.mulf %29, %31 : vector<16x32xf32>
      %c0_17 = arith.constant 0 : index
      %c0_18 = arith.constant 0 : index
      %33 = vector.load %arg4[%c0_17, %c0_18] : memref<1x32xf32, #tpu.memory_space<vmem>>, vector<1x32xf32>
      %34 = vector.broadcast %33 : vector<1x32xf32> to vector<16x32xf32>
      %35 = arith.addf %32, %34 : vector<16x32xf32>
      %36 = arith.truncf %35 : vector<16x32xf32> to vector<16x32xbf16>
      %c0_19 = arith.constant 0 : index
      %c0_20 = arith.constant 0 : index
      %37 = vector.load %arg8[%c0_19, %c0_20] : memref<16x32xbf16, #tpu.memory_space<vmem>>, vector<16x32xbf16>
      tpu.vector_store %arg8[%c0_19, %c0_20], %36 {strides = array<i32>} : memref<16x32xbf16, #tpu.memory_space<vmem>>, vector<16x32xbf16>,
    } else {
    }
    %c0 = arith.constant 0 : index
    %c0_1 = arith.constant 0 : index
    %3 = vector.load %arg8[%c0, %c0_1] : memref<16x32xbf16, #tpu.memory_space<vmem>>, vector<16x32xbf16>
    %c0_2 = arith.constant 0 : index
    %c0_3 = arith.constant 0 : index
    %4 = vector.load %arg5[%c0_2, %c0_3] : memref<32x96xbf16, #tpu.memory_space<vmem>>, vector<32x96xbf16>
    %cst = arith.constant dense<0.000000e+00> : vector<16x96xf32>
    %5 = tpu.matmul %3, %4, %cst {dimension_numbers = #tpu.dot_dimension_numbers<[1], [0], [0], [1], [0, 0, 1, 1], [], []>} : vector<16x32xbf16>, vector<32x96xbf16>, vector<16x96xf32> -> vector<16x96xf32>
    %c0_4 = arith.constant 0 : index
    %c0_5 = arith.constant 0 : index
    %6 = vector.load %arg6[%c0_4, %c0_5] : memref<1x96xf32, #tpu.memory_space<vmem>>, vector<1x96xf32>
    %7 = vector.broadcast %6 : vector<1x96xf32> to vector<16x96xf32>
    %8 = arith.addf %5, %7 : vector<16x96xf32>
    %9 = arith.truncf %8 : vector<16x96xf32> to vector<16x96xbf16>
    %c0_6 = arith.constant 0 : index
    %c0_7 = arith.constant 0 : index
    %10 = vector.load %arg7[%c0_6, %c0_7] : memref<16x96xbf16, #tpu.memory_space<vmem>>, vector<16x96xbf16>
    tpu.vector_store %arg7[%c0_6, %c0_7], %9 {strides = array<i32>} : memref<16x96xbf16, #tpu.memory_space<vmem>>, vector<16x96xbf16>,
    return
  }
  func.func @transform_0(%arg0: i32, %arg1: i32) -> (i32, i32) {
    %c0_i32 = arith.constant 0 : i32
    %c0_i32_0 = arith.constant 0 : i32
    return %arg0, %c0_i32 : i32, i32
  }
  func.func @transform_1(%arg0: i32, %arg1: i32) -> (i32, i32) {
    %c0_i32 = arith.constant 0 : i32
    %c0_i32_0 = arith.constant 0 : i32
    %c0_i32_1 = arith.constant 0 : i32
    return %c0_i32, %c0_i32_0 : i32, i32
  }
  func.func @transform_2(%arg0: i32, %arg1: i32) -> (i32, i32) {
    %c0_i32 = arith.constant 0 : i32
    %c0_i32_0 = arith.constant 0 : i32
    %c0_i32_1 = arith.constant 0 : i32
    return %c0_i32, %c0_i32_0 : i32, i32
  }
  func.func @transform_3(%arg0: i32, %arg1: i32) -> (i32, i32) {
    %c0_i32 = arith.constant 0 : i32
    %c0_i32_0 = arith.constant 0 : i32
    return %c0_i32, %arg1 : i32, i32
  }
  func.func @transform_4(%arg0: i32, %arg1: i32) -> (i32, i32) {
    %c0_i32 = arith.constant 0 : i32
    %c0_i32_0 = arith.constant 0 : i32
    return %c0_i32, %arg1 : i32, i32
  }
  func.func @transform_5(%arg0: i32, %arg1: i32) -> (i32, i32) {
    %c0_i32 = arith.constant 0 : i32
    return %arg0, %arg1 : i32, i32
  }
}

module attributes {stable_mosaic.version = 11 : i64} {
  func.func @_attn_kernel_full(%arg0: i32, %arg1: memref<1x8x96xbf16, #tpu.memory_space<vmem>>, %arg2: memref<1x8x32xbf16, #tpu.memory_space<vmem>>) attributes {dimension_semantics = [#tpu.dimension_semantics<parallel>], iteration_bounds = array<i64: 2>, scalar_prefetch = 0 : i64, scratch_operands = 0 : i64, tpu.core_type = #tpu.core_type<tc>, window_params = [{transform_indices = @transform_0, window_bounds = array<i64: 1, 8, 96>}, {transform_indices = @transform_1, window_bounds = array<i64: 1, 8, 32>}]} {
    %c0 = arith.constant 0 : index
    %c0_0 = arith.constant 0 : index
    %c0_1 = arith.constant 0 : index
    %0 = vector.load %arg1[%c0, %c0_0, %c0_1] : memref<1x8x96xbf16, #tpu.memory_space<vmem>>, vector<1x8x8xbf16>
    %1 = vector.shape_cast %0 : vector<1x8x8xbf16> to vector<8x8xbf16>
    %c0_2 = arith.constant 0 : index
    %c0_3 = arith.constant 0 : index
    %c32 = arith.constant 32 : index
    %2 = vector.load %arg1[%c0_2, %c0_3, %c32] : memref<1x8x96xbf16, #tpu.memory_space<vmem>>, vector<1x8x8xbf16>
    %3 = vector.shape_cast %2 : vector<1x8x8xbf16> to vector<8x8xbf16>
    %c0_4 = arith.constant 0 : index
    %c0_5 = arith.constant 0 : index
    %c64 = arith.constant 64 : index
    %4 = vector.load %arg1[%c0_4, %c0_5, %c64] : memref<1x8x96xbf16, #tpu.memory_space<vmem>>, vector<1x8x8xbf16>
    %5 = vector.shape_cast %4 : vector<1x8x8xbf16> to vector<8x8xbf16>
    %cst = arith.constant dense<0.000000e+00> : vector<8x8xf32>
    %6 = tpu.matmul %1, %3, %cst {dimension_numbers = #tpu.dot_dimension_numbers<[1], [1], [0], [0], [0, 0, 1, 0], [], []>} : vector<8x8xbf16>, vector<8x8xbf16>, vector<8x8xf32> -> vector<8x8xf32>
    %7 = tpu.iota {dimensions = array<i32: 1>} : vector<8x8xi32>
    %c5_i32 = arith.constant 5 : i32
    %8 = vector.broadcast %c5_i32 : i32 to vector<8x8xi32>
    %9 = arith.cmpi slt, %7, %8 : vector<8x8xi32>
    %cst_6 = arith.constant -1.000000e+30 : f32
    %10 = vector.broadcast %cst_6 : f32 to vector<8x8xf32>
    %11 = arith.select %9, %6, %10 : vector<8x8xi1>, vector<8x8xf32>
    %cst_7 = arith.constant dense<0xFF800000> : vector<8xf32>
    %12 = vector.multi_reduction <maximumf>, %11, %cst_7 [1] : vector<8x8xf32> to vector<8xf32>
    %13 = vector.shape_cast %12 : vector<8xf32> to vector<8x1xf32>
    %14 = vector.broadcast %13 : vector<8x1xf32> to vector<8x8xf32>
    %15 = arith.subf %11, %14 : vector<8x8xf32>
    %16 = math.exp %15 : vector<8x8xf32>
    %cst_8 = arith.constant dense<0.000000e+00> : vector<8xf32>
    %17 = vector.multi_reduction <add>, %16, %cst_8 [1] : vector<8x8xf32> to vector<8xf32>
    %18 = vector.shape_cast %17 : vector<8xf32> to vector<8x1xf32>
    %19 = tpu.reciprocal %18 {approx = true} : vector<8x1xf32> -> vector<8x1xf32>
    %20 = vector.broadcast %19 : vector<8x1xf32> to vector<8x8xf32>
    %21 = arith.mulf %16, %20 : vector<8x8xf32>
    %22 = arith.truncf %21 : vector<8x8xf32> to vector<8x8xbf16>
    %cst_9 = arith.constant dense<0.000000e+00> : vector<8x8xf32>
    %23 = tpu.matmul %22, %5, %cst_9 {dimension_numbers = #tpu.dot_dimension_numbers<[1], [0], [0], [1], [0, 0, 1, 1], [], []>} : vector<8x8xbf16>, vector<8x8xbf16>, vector<8x8xf32> -> vector<8x8xf32>
    %24 = arith.truncf %23 : vector<8x8xf32> to vector<8x8xbf16>
    %c0_10 = arith.constant 0 : index
    %c0_11 = arith.constant 0 : index
    %c0_12 = arith.constant 0 : index
    %25 = vector.load %arg2[%c0_10, %c0_11, %c0_12] : memref<1x8x32xbf16, #tpu.memory_space<vmem>>, vector<1x8x8xbf16>
    %26 = vector.shape_cast %25 : vector<1x8x8xbf16> to vector<8x8xbf16>
    %27 = vector.shape_cast %24 : vector<8x8xbf16> to vector<1x8x8xbf16>
    tpu.vector_store %arg2[%c0_10, %c0_11, %c0_12], %27 {strides = array<i32>} : memref<1x8x32xbf16, #tpu.memory_space<vmem>>, vector<1x8x8xbf16>,
    %c0_13 = arith.constant 0 : index
    %c0_14 = arith.constant 0 : index
    %c8 = arith.constant 8 : index
    %28 = vector.load %arg1[%c0_13, %c0_14, %c8] : memref<1x8x96xbf16, #tpu.memory_space<vmem>>, vector<1x8x8xbf16>
    %29 = vector.shape_cast %28 : vector<1x8x8xbf16> to vector<8x8xbf16>
    %c0_15 = arith.constant 0 : index
    %c0_16 = arith.constant 0 : index
    %c40 = arith.constant 40 : index
    %30 = vector.load %arg1[%c0_15, %c0_16, %c40] : memref<1x8x96xbf16, #tpu.memory_space<vmem>>, vector<1x8x8xbf16>
    %31 = vector.shape_cast %30 : vector<1x8x8xbf16> to vector<8x8xbf16>
    %c0_17 = arith.constant 0 : index
    %c0_18 = arith.constant 0 : index
    %c72 = arith.constant 72 : index
    %32 = vector.load %arg1[%c0_17, %c0_18, %c72] : memref<1x8x96xbf16, #tpu.memory_space<vmem>>, vector<1x8x8xbf16>
    %33 = vector.shape_cast %32 : vector<1x8x8xbf16> to vector<8x8xbf16>
    %cst_19 = arith.constant dense<0.000000e+00> : vector<8x8xf32>
    %34 = tpu.matmul %29, %31, %cst_19 {dimension_numbers = #tpu.dot_dimension_numbers<[1], [1], [0], [0], [0, 0, 1, 0], [], []>} : vector<8x8xbf16>, vector<8x8xbf16>, vector<8x8xf32> -> vector<8x8xf32>
    %35 = tpu.iota {dimensions = array<i32: 1>} : vector<8x8xi32>
    %c5_i32_20 = arith.constant 5 : i32
    %36 = vector.broadcast %c5_i32_20 : i32 to vector<8x8xi32>
    %37 = arith.cmpi slt, %35, %36 : vector<8x8xi32>
    %cst_21 = arith.constant -1.000000e+30 : f32
    %38 = vector.broadcast %cst_21 : f32 to vector<8x8xf32>
    %39 = arith.select %37, %34, %38 : vector<8x8xi1>, vector<8x8xf32>
    %cst_22 = arith.constant dense<0xFF800000> : vector<8xf32>
    %40 = vector.multi_reduction <maximumf>, %39, %cst_22 [1] : vector<8x8xf32> to vector<8xf32>
    %41 = vector.shape_cast %40 : vector<8xf32> to vector<8x1xf32>
    %42 = vector.broadcast %41 : vector<8x1xf32> to vector<8x8xf32>
    %43 = arith.subf %39, %42 : vector<8x8xf32>
    %44 = math.exp %43 : vector<8x8xf32>
    %cst_23 = arith.constant dense<0.000000e+00> : vector<8xf32>
    %45 = vector.multi_reduction <add>, %44, %cst_23 [1] : vector<8x8xf32> to vector<8xf32>
    %46 = vector.shape_cast %45 : vector<8xf32> to vector<8x1xf32>
    %47 = tpu.reciprocal %46 {approx = true} : vector<8x1xf32> -> vector<8x1xf32>
    %48 = vector.broadcast %47 : vector<8x1xf32> to vector<8x8xf32>
    %49 = arith.mulf %44, %48 : vector<8x8xf32>
    %50 = arith.truncf %49 : vector<8x8xf32> to vector<8x8xbf16>
    %cst_24 = arith.constant dense<0.000000e+00> : vector<8x8xf32>
    %51 = tpu.matmul %50, %33, %cst_24 {dimension_numbers = #tpu.dot_dimension_numbers<[1], [0], [0], [1], [0, 0, 1, 1], [], []>} : vector<8x8xbf16>, vector<8x8xbf16>, vector<8x8xf32> -> vector<8x8xf32>
    %52 = arith.truncf %51 : vector<8x8xf32> to vector<8x8xbf16>
    %c0_25 = arith.constant 0 : index
    %c0_26 = arith.constant 0 : index
    %c8_27 = arith.constant 8 : index
    %53 = vector.load %arg2[%c0_25, %c0_26, %c8_27] : memref<1x8x32xbf16, #tpu.memory_space<vmem>>, vector<1x8x8xbf16>
    %54 = vector.shape_cast %53 : vector<1x8x8xbf16> to vector<8x8xbf16>
    %55 = vector.shape_cast %52 : vector<8x8xbf16> to vector<1x8x8xbf16>
    tpu.vector_store %arg2[%c0_25, %c0_26, %c8_27], %55 {strides = array<i32>} : memref<1x8x32xbf16, #tpu.memory_space<vmem>>, vector<1x8x8xbf16>,
    %c0_28 = arith.constant 0 : index
    %c0_29 = arith.constant 0 : index
    %c16 = arith.constant 16 : index
    %56 = vector.load %arg1[%c0_28, %c0_29, %c16] : memref<1x8x96xbf16, #tpu.memory_space<vmem>>, vector<1x8x8xbf16>
    %57 = vector.shape_cast %56 : vector<1x8x8xbf16> to vector<8x8xbf16>
    %c0_30 = arith.constant 0 : index
    %c0_31 = arith.constant 0 : index
    %c48 = arith.constant 48 : index
    %58 = vector.load %arg1[%c0_30, %c0_31, %c48] : memref<1x8x96xbf16, #tpu.memory_space<vmem>>, vector<1x8x8xbf16>
    %59 = vector.shape_cast %58 : vector<1x8x8xbf16> to vector<8x8xbf16>
    %c0_32 = arith.constant 0 : index
    %c0_33 = arith.constant 0 : index
    %c80 = arith.constant 80 : index
    %60 = vector.load %arg1[%c0_32, %c0_33, %c80] : memref<1x8x96xbf16, #tpu.memory_space<vmem>>, vector<1x8x8xbf16>
    %61 = vector.shape_cast %60 : vector<1x8x8xbf16> to vector<8x8xbf16>
    %cst_34 = arith.constant dense<0.000000e+00> : vector<8x8xf32>
    %62 = tpu.matmul %57, %59, %cst_34 {dimension_numbers = #tpu.dot_dimension_numbers<[1], [1], [0], [0], [0, 0, 1, 0], [], []>} : vector<8x8xbf16>, vector<8x8xbf16>, vector<8x8xf32> -> vector<8x8xf32>
    %63 = tpu.iota {dimensions = array<i32: 1>} : vector<8x8xi32>
    %c5_i32_35 = arith.constant 5 : i32
    %64 = vector.broadcast %c5_i32_35 : i32 to vector<8x8xi32>
    %65 = arith.cmpi slt, %63, %64 : vector<8x8xi32>
    %cst_36 = arith.constant -1.000000e+30 : f32
    %66 = vector.broadcast %cst_36 : f32 to vector<8x8xf32>
    %67 = arith.select %65, %62, %66 : vector<8x8xi1>, vector<8x8xf32>
    %cst_37 = arith.constant dense<0xFF800000> : vector<8xf32>
    %68 = vector.multi_reduction <maximumf>, %67, %cst_37 [1] : vector<8x8xf32> to vector<8xf32>
    %69 = vector.shape_cast %68 : vector<8xf32> to vector<8x1xf32>
    %70 = vector.broadcast %69 : vector<8x1xf32> to vector<8x8xf32>
    %71 = arith.subf %67, %70 : vector<8x8xf32>
    %72 = math.exp %71 : vector<8x8xf32>
    %cst_38 = arith.constant dense<0.000000e+00> : vector<8xf32>
    %73 = vector.multi_reduction <add>, %72, %cst_38 [1] : vector<8x8xf32> to vector<8xf32>
    %74 = vector.shape_cast %73 : vector<8xf32> to vector<8x1xf32>
    %75 = tpu.reciprocal %74 {approx = true} : vector<8x1xf32> -> vector<8x1xf32>
    %76 = vector.broadcast %75 : vector<8x1xf32> to vector<8x8xf32>
    %77 = arith.mulf %72, %76 : vector<8x8xf32>
    %78 = arith.truncf %77 : vector<8x8xf32> to vector<8x8xbf16>
    %cst_39 = arith.constant dense<0.000000e+00> : vector<8x8xf32>
    %79 = tpu.matmul %78, %61, %cst_39 {dimension_numbers = #tpu.dot_dimension_numbers<[1], [0], [0], [1], [0, 0, 1, 1], [], []>} : vector<8x8xbf16>, vector<8x8xbf16>, vector<8x8xf32> -> vector<8x8xf32>
    %80 = arith.truncf %79 : vector<8x8xf32> to vector<8x8xbf16>
    %c0_40 = arith.constant 0 : index
    %c0_41 = arith.constant 0 : index
    %c16_42 = arith.constant 16 : index
    %81 = vector.load %arg2[%c0_40, %c0_41, %c16_42] : memref<1x8x32xbf16, #tpu.memory_space<vmem>>, vector<1x8x8xbf16>
    %82 = vector.shape_cast %81 : vector<1x8x8xbf16> to vector<8x8xbf16>
    %83 = vector.shape_cast %80 : vector<8x8xbf16> to vector<1x8x8xbf16>
    tpu.vector_store %arg2[%c0_40, %c0_41, %c16_42], %83 {strides = array<i32>} : memref<1x8x32xbf16, #tpu.memory_space<vmem>>, vector<1x8x8xbf16>,
    %c0_43 = arith.constant 0 : index
    %c0_44 = arith.constant 0 : index
    %c24 = arith.constant 24 : index
    %84 = vector.load %arg1[%c0_43, %c0_44, %c24] : memref<1x8x96xbf16, #tpu.memory_space<vmem>>, vector<1x8x8xbf16>
    %85 = vector.shape_cast %84 : vector<1x8x8xbf16> to vector<8x8xbf16>
    %c0_45 = arith.constant 0 : index
    %c0_46 = arith.constant 0 : index
    %c56 = arith.constant 56 : index
    %86 = vector.load %arg1[%c0_45, %c0_46, %c56] : memref<1x8x96xbf16, #tpu.memory_space<vmem>>, vector<1x8x8xbf16>
    %87 = vector.shape_cast %86 : vector<1x8x8xbf16> to vector<8x8xbf16>
    %c0_47 = arith.constant 0 : index
    %c0_48 = arith.constant 0 : index
    %c88 = arith.constant 88 : index
    %88 = vector.load %arg1[%c0_47, %c0_48, %c88] : memref<1x8x96xbf16, #tpu.memory_space<vmem>>, vector<1x8x8xbf16>
    %89 = vector.shape_cast %88 : vector<1x8x8xbf16> to vector<8x8xbf16>
    %cst_49 = arith.constant dense<0.000000e+00> : vector<8x8xf32>
    %90 = tpu.matmul %85, %87, %cst_49 {dimension_numbers = #tpu.dot_dimension_numbers<[1], [1], [0], [0], [0, 0, 1, 0], [], []>} : vector<8x8xbf16>, vector<8x8xbf16>, vector<8x8xf32> -> vector<8x8xf32>
    %91 = tpu.iota {dimensions = array<i32: 1>} : vector<8x8xi32>
    %c5_i32_50 = arith.constant 5 : i32
    %92 = vector.broadcast %c5_i32_50 : i32 to vector<8x8xi32>
    %93 = arith.cmpi slt, %91, %92 : vector<8x8xi32>
    %cst_51 = arith.constant -1.000000e+30 : f32
    %94 = vector.broadcast %cst_51 : f32 to vector<8x8xf32>
    %95 = arith.select %93, %90, %94 : vector<8x8xi1>, vector<8x8xf32>
    %cst_52 = arith.constant dense<0xFF800000> : vector<8xf32>
    %96 = vector.multi_reduction <maximumf>, %95, %cst_52 [1] : vector<8x8xf32> to vector<8xf32>
    %97 = vector.shape_cast %96 : vector<8xf32> to vector<8x1xf32>
    %98 = vector.broadcast %97 : vector<8x1xf32> to vector<8x8xf32>
    %99 = arith.subf %95, %98 : vector<8x8xf32>
    %100 = math.exp %99 : vector<8x8xf32>
    %cst_53 = arith.constant dense<0.000000e+00> : vector<8xf32>
    %101 = vector.multi_reduction <add>, %100, %cst_53 [1] : vector<8x8xf32> to vector<8xf32>
    %102 = vector.shape_cast %101 : vector<8xf32> to vector<8x1xf32>
    %103 = tpu.reciprocal %102 {approx = true} : vector<8x1xf32> -> vector<8x1xf32>
    %104 = vector.broadcast %103 : vector<8x1xf32> to vector<8x8xf32>
    %105 = arith.mulf %100, %104 : vector<8x8xf32>
    %106 = arith.truncf %105 : vector<8x8xf32> to vector<8x8xbf16>
    %cst_54 = arith.constant dense<0.000000e+00> : vector<8x8xf32>
    %107 = tpu.matmul %106, %89, %cst_54 {dimension_numbers = #tpu.dot_dimension_numbers<[1], [0], [0], [1], [0, 0, 1, 1], [], []>} : vector<8x8xbf16>, vector<8x8xbf16>, vector<8x8xf32> -> vector<8x8xf32>
    %108 = arith.truncf %107 : vector<8x8xf32> to vector<8x8xbf16>
    %c0_55 = arith.constant 0 : index
    %c0_56 = arith.constant 0 : index
    %c24_57 = arith.constant 24 : index
    %109 = vector.load %arg2[%c0_55, %c0_56, %c24_57] : memref<1x8x32xbf16, #tpu.memory_space<vmem>>, vector<1x8x8xbf16>
    %110 = vector.shape_cast %109 : vector<1x8x8xbf16> to vector<8x8xbf16>
    %111 = vector.shape_cast %108 : vector<8x8xbf16> to vector<1x8x8xbf16>
    tpu.vector_store %arg2[%c0_55, %c0_56, %c24_57], %111 {strides = array<i32>} : memref<1x8x32xbf16, #tpu.memory_space<vmem>>, vector<1x8x8xbf16>,
    return
  }
  func.func @transform_0(%arg0: i32) -> (i32, i32, i32) {
    %c0_i32 = arith.constant 0 : i32
    %c0_i32_0 = arith.constant 0 : i32
    %c0_i32_1 = arith.constant 0 : i32
    return %arg0, %c0_i32, %c0_i32_0 : i32, i32, i32
  }
  func.func @transform_1(%arg0: i32) -> (i32, i32, i32) {
    %c0_i32 = arith.constant 0 : i32
    %c0_i32_0 = arith.constant 0 : i32
    %c0_i32_1 = arith.constant 0 : i32
    return %arg0, %c0_i32, %c0_i32_0 : i32, i32, i32
  }
}

module attributes {stable_mosaic.version = 11 : i64} {
  func.func @_mm_fullk_kernel(%arg0: i32, %arg1: i32, %arg2: memref<16x32xbf16, #tpu.memory_space<vmem>>, %arg3: memref<32x32xbf16, #tpu.memory_space<vmem>>, %arg4: memref<1x32xf32, #tpu.memory_space<vmem>>, %arg5: memref<16x32xf32, #tpu.memory_space<vmem>>, %arg6: memref<16x32xf32, #tpu.memory_space<vmem>>) attributes {dimension_semantics = [#tpu.dimension_semantics<parallel>, #tpu.dimension_semantics<parallel>], iteration_bounds = array<i64: 1, 1>, scalar_prefetch = 0 : i64, scratch_operands = 0 : i64, tpu.core_type = #tpu.core_type<tc>, window_params = [{transform_indices = @transform_0, window_bounds = array<i64: 16, 32>}, {transform_indices = @transform_1, window_bounds = array<i64: 32, 32>}, {transform_indices = @transform_2, window_bounds = array<i64: 1, 32>}, {transform_indices = @transform_3, window_bounds = array<i64: 16, 32>}, {transform_indices = @transform_4, window_bounds = array<i64: 16, 32>}]} {
    %c0 = arith.constant 0 : index
    %c0_0 = arith.constant 0 : index
    %0 = vector.load %arg2[%c0, %c0_0] : memref<16x32xbf16, #tpu.memory_space<vmem>>, vector<16x32xbf16>
    %c0_1 = arith.constant 0 : index
    %c0_2 = arith.constant 0 : index
    %1 = vector.load %arg3[%c0_1, %c0_2] : memref<32x32xbf16, #tpu.memory_space<vmem>>, vector<32x32xbf16>
    %cst = arith.constant dense<0.000000e+00> : vector<16x32xf32>
    %2 = tpu.matmul %0, %1, %cst {dimension_numbers = #tpu.dot_dimension_numbers<[1], [0], [0], [1], [0, 0, 1, 1], [], []>} : vector<16x32xbf16>, vector<32x32xbf16>, vector<16x32xf32> -> vector<16x32xf32>
    %c0_3 = arith.constant 0 : index
    %c0_4 = arith.constant 0 : index
    %3 = vector.load %arg4[%c0_3, %c0_4] : memref<1x32xf32, #tpu.memory_space<vmem>>, vector<1x32xf32>
    %4 = vector.broadcast %3 : vector<1x32xf32> to vector<16x32xf32>
    %5 = arith.addf %2, %4 : vector<16x32xf32>
    %c0_5 = arith.constant 0 : index
    %c0_6 = arith.constant 0 : index
    %6 = vector.load %arg5[%c0_5, %c0_6] : memref<16x32xf32, #tpu.memory_space<vmem>>, vector<16x32xf32>
    %7 = arith.addf %5, %6 : vector<16x32xf32>
    %c0_7 = arith.constant 0 : index
    %c0_8 = arith.constant 0 : index
    %8 = vector.load %arg6[%c0_7, %c0_8] : memref<16x32xf32, #tpu.memory_space<vmem>>, vector<16x32xf32>
    tpu.vector_store %arg6[%c0_7, %c0_8], %7 {strides = array<i32>} : memref<16x32xf32, #tpu.memory_space<vmem>>, vector<16x32xf32>,
    return
  }
  func.func @transform_0(%arg0: i32, %arg1: i32) -> (i32, i32) {
    %c0_i32 = arith.constant 0 : i32
    %c0_i32_0 = arith.constant 0 : i32
    return %arg0, %c0_i32 : i32, i32
  }
  func.func @transform_1(%arg0: i32, %arg1: i32) -> (i32, i32) {
    %c0_i32 = arith.constant 0 : i32
    %c0_i32_0 = arith.constant 0 : i32
    return %c0_i32, %arg1 : i32, i32
  }
  func.func @transform_2(%arg0: i32, %arg1: i32) -> (i32, i32) {
    %c0_i32 = arith.constant 0 : i32
    %c0_i32_0 = arith.constant 0 : i32
    return %c0_i32, %arg1 : i32, i32
  }
  func.func @transform_3(%arg0: i32, %arg1: i32) -> (i32, i32) {
    %c0_i32 = arith.constant 0 : i32
    return %arg0, %arg1 : i32, i32
  }
  func.func @transform_4(%arg0: i32, %arg1: i32) -> (i32, i32) {
    %c0_i32 = arith.constant 0 : i32
    return %arg0, %arg1 : i32, i32
  }
}

module attributes {stable_mosaic.version = 11 : i64} {
  func.func @_mm_fullk_kernel(%arg0: i32, %arg1: i32, %arg2: memref<16x32xf32, #tpu.memory_space<vmem>>, %arg3: memref<1x32xf32, #tpu.memory_space<vmem>>, %arg4: memref<1x32xf32, #tpu.memory_space<vmem>>, %arg5: memref<32x128xbf16, #tpu.memory_space<vmem>>, %arg6: memref<1x128xf32, #tpu.memory_space<vmem>>, %arg7: memref<16x128xbf16, #tpu.memory_space<vmem>>, %arg8: memref<16x32xbf16, #tpu.memory_space<vmem>>) attributes {dimension_semantics = [#tpu.dimension_semantics<parallel>, #tpu.dimension_semantics<arbitrary>], iteration_bounds = array<i64: 1, 1>, scalar_prefetch = 0 : i64, scratch_operands = 1 : i64, tpu.core_type = #tpu.core_type<tc>, window_params = [{transform_indices = @transform_0, window_bounds = array<i64: 16, 32>}, {pipeline_mode = #tpu.pipeline_mode<synchronous>, transform_indices = @transform_1, window_bounds = array<i64: 1, 32>}, {pipeline_mode = #tpu.pipeline_mode<synchronous>, transform_indices = @transform_2, window_bounds = array<i64: 1, 32>}, {transform_indices = @transform_3, window_bounds = array<i64: 32, 128>}, {transform_indices = @transform_4, window_bounds = array<i64: 1, 128>}, {transform_indices = @transform_5, window_bounds = array<i64: 16, 128>}]} {
    %c0_i32 = arith.constant 0 : i32
    %0 = arith.cmpi eq, %arg1, %c0_i32 : i32
    %1 = arith.extui %0 : i1 to i32
    %c0_i32_0 = arith.constant 0 : i32
    %2 = arith.cmpi ne, %1, %c0_i32_0 : i32
    scf.if %2 {
      %c0_10 = arith.constant 0 : index
      %c0_11 = arith.constant 0 : index
      %19 = vector.load %arg2[%c0_10, %c0_11] : memref<16x32xf32, #tpu.memory_space<vmem>>, vector<16x32xf32>
      %cst_12 = arith.constant dense<0.000000e+00> : vector<16xf32>
      %20 = vector.multi_reduction <add>, %19, %cst_12 [1] : vector<16x32xf32> to vector<16xf32>
      %21 = vector.shape_cast %20 : vector<16xf32> to vector<16x1xf32>
      %cst_13 = arith.constant 3.200000e+01 : f32
      %22 = vector.broadcast %cst_13 : f32 to vector<16x1xf32>
      %23 = arith.divf %21, %22 : vector<16x1xf32>
      %24 = vector.broadcast %23 : vector<16x1xf32> to vector<16x32xf32>
      %25 = arith.subf %19, %24 : vector<16x32xf32>
      %26 = arith.mulf %25, %25 : vector<16x32xf32>
      %cst_14 = arith.constant dense<0.000000e+00> : vector<16xf32>
      %27 = vector.multi_reduction <add>, %26, %cst_14 [1] : vector<16x32xf32> to vector<16xf32>
      %28 = vector.shape_cast %27 : vector<16xf32> to vector<16x1xf32>
      %cst_15 = arith.constant 3.200000e+01 : f32
      %29 = vector.broadcast %cst_15 : f32 to vector<16x1xf32>
      %30 = arith.divf %28, %29 : vector<16x1xf32>
      %31 = vector.broadcast %23 : vector<16x1xf32> to vector<16x32xf32>
      %32 = arith.subf %19, %31 : vector<16x32xf32>
      %cst_16 = arith.constant 9.99999974E-6 : f32
      %33 = vector.broadcast %cst_16 : f32 to vector<16x1xf32>
      %34 = arith.addf %30, %33 : vector<16x1xf32>
      %35 = math.rsqrt %34 : vector<16x1xf32>
      %36 = vector.broadcast %35 : vector<16x1xf32> to vector<16x32xf32>
      %37 = arith.mulf %32, %36 : vector<16x32xf32>
      %c0_17 = arith.constant 0 : index
      %c0_18 = arith.constant 0 : index
      %38 = vector.load %arg3[%c0_17, %c0_18] : memref<1x32xf32, #tpu.memory_space<vmem>>, vector<1x32xf32>
      %39 = vector.broadcast %38 : vector<1x32xf32> to vector<16x32xf32>
      %40 = arith.mulf %37, %39 : vector<16x32xf32>
      %c0_19 = arith.constant 0 : index
      %c0_20 = arith.constant 0 : index
      %41 = vector.load %arg4[%c0_19, %c0_20] : memref<1x32xf32, #tpu.memory_space<vmem>>, vector<1x32xf32>
      %42 = vector.broadcast %41 : vector<1x32xf32> to vector<16x32xf32>
      %43 = arith.addf %40, %42 : vector<16x32xf32>
      %44 = arith.truncf %43 : vector<16x32xf32> to vector<16x32xbf16>
      %c0_21 = arith.constant 0 : index
      %c0_22 = arith.constant 0 : index
      %45 = vector.load %arg8[%c0_21, %c0_22] : memref<16x32xbf16, #tpu.memory_space<vmem>>, vector<16x32xbf16>
      tpu.vector_store %arg8[%c0_21, %c0_22], %44 {strides = array<i32>} : memref<16x32xbf16, #tpu.memory_space<vmem>>, vector<16x32xbf16>,
    } else {
    }
    %c0 = arith.constant 0 : index
    %c0_1 = arith.constant 0 : index
    %3 = vector.load %arg8[%c0, %c0_1] : memref<16x32xbf16, #tpu.memory_space<vmem>>, vector<16x32xbf16>
    %c0_2 = arith.constant 0 : index
    %c0_3 = arith.constant 0 : index
    %4 = vector.load %arg5[%c0_2, %c0_3] : memref<32x128xbf16, #tpu.memory_space<vmem>>, vector<32x128xbf16>
    %cst = arith.constant dense<0.000000e+00> : vector<16x128xf32>
    %5 = tpu.matmul %3, %4, %cst {dimension_numbers = #tpu.dot_dimension_numbers<[1], [0], [0], [1], [0, 0, 1, 1], [], []>} : vector<16x32xbf16>, vector<32x128xbf16>, vector<16x128xf32> -> vector<16x128xf32>
    %c0_4 = arith.constant 0 : index
    %c0_5 = arith.constant 0 : index
    %6 = vector.load %arg6[%c0_4, %c0_5] : memref<1x128xf32, #tpu.memory_space<vmem>>, vector<1x128xf32>
    %7 = vector.broadcast %6 : vector<1x128xf32> to vector<16x128xf32>
    %8 = arith.addf %5, %7 : vector<16x128xf32>
    %cst_6 = arith.constant 1.702000e+00 : f32
    %9 = vector.broadcast %cst_6 : f32 to vector<16x128xf32>
    %10 = arith.mulf %9, %8 : vector<16x128xf32>
    %11 = arith.negf %10 : vector<16x128xf32>
    %12 = math.exp %11 : vector<16x128xf32>
    %cst_7 = arith.constant 1.000000e+00 : f32
    %13 = vector.broadcast %cst_7 : f32 to vector<16x128xf32>
    %14 = arith.addf %13, %12 : vector<16x128xf32>
    %15 = arith.divf %13, %14 : vector<16x128xf32>
    %16 = arith.mulf %8, %15 : vector<16x128xf32>
    %17 = arith.truncf %16 : vector<16x128xf32> to vector<16x128xbf16>
    %c0_8 = arith.constant 0 : index
    %c0_9 = arith.constant 0 : index
    %18 = vector.load %arg7[%c0_8, %c0_9] : memref<16x128xbf16, #tpu.memory_space<vmem>>, vector<16x128xbf16>
    tpu.vector_store %arg7[%c0_8, %c0_9], %17 {strides = array<i32>} : memref<16x128xbf16, #tpu.memory_space<vmem>>, vector<16x128xbf16>,
    return
  }
  func.func @transform_0(%arg0: i32, %arg1: i32) -> (i32, i32) {
    %c0_i32 = arith.constant 0 : i32
    %c0_i32_0 = arith.constant 0 : i32
    return %arg0, %c0_i32 : i32, i32
  }
  func.func @transform_1(%arg0: i32, %arg1: i32) -> (i32, i32) {
    %c0_i32 = arith.constant 0 : i32
    %c0_i32_0 = arith.constant 0 : i32
    %c0_i32_1 = arith.constant 0 : i32
    return %c0_i32, %c0_i32_0 : i32, i32
  }
  func.func @transform_2(%arg0: i32, %arg1: i32) -> (i32, i32) {
    %c0_i32 = arith.constant 0 : i32
    %c0_i32_0 = arith.constant 0 : i32
    %c0_i32_1 = arith.constant 0 : i32
    return %c0_i32, %c0_i32_0 : i32, i32
  }
  func.func @transform_3(%arg0: i32, %arg1: i32) -> (i32, i32) {
    %c0_i32 = arith.constant 0 : i32
    %c0_i32_0 = arith.constant 0 : i32
    return %c0_i32, %arg1 : i32, i32
  }
  func.func @transform_4(%arg0: i32, %arg1: i32) -> (i32, i32) {
    %c0_i32 = arith.constant 0 : i32
    %c0_i32_0 = arith.constant 0 : i32
    return %c0_i32, %arg1 : i32, i32
  }
  func.func @transform_5(%arg0: i32, %arg1: i32) -> (i32, i32) {
    %c0_i32 = arith.constant 0 : i32
    return %arg0, %arg1 : i32, i32
  }
}

module attributes {stable_mosaic.version = 11 : i64} {
  func.func @_mm_fullk_kernel(%arg0: i32, %arg1: i32, %arg2: memref<16x128xbf16, #tpu.memory_space<vmem>>, %arg3: memref<128x32xbf16, #tpu.memory_space<vmem>>, %arg4: memref<1x32xf32, #tpu.memory_space<vmem>>, %arg5: memref<16x32xf32, #tpu.memory_space<vmem>>, %arg6: memref<16x32xf32, #tpu.memory_space<vmem>>) attributes {dimension_semantics = [#tpu.dimension_semantics<parallel>, #tpu.dimension_semantics<parallel>], iteration_bounds = array<i64: 1, 1>, scalar_prefetch = 0 : i64, scratch_operands = 0 : i64, tpu.core_type = #tpu.core_type<tc>, window_params = [{transform_indices = @transform_0, window_bounds = array<i64: 16, 128>}, {transform_indices = @transform_1, window_bounds = array<i64: 128, 32>}, {transform_indices = @transform_2, window_bounds = array<i64: 1, 32>}, {transform_indices = @transform_3, window_bounds = array<i64: 16, 32>}, {transform_indices = @transform_4, window_bounds = array<i64: 16, 32>}]} {
    %c0 = arith.constant 0 : index
    %c0_0 = arith.constant 0 : index
    %0 = vector.load %arg2[%c0, %c0_0] : memref<16x128xbf16, #tpu.memory_space<vmem>>, vector<16x128xbf16>
    %c0_1 = arith.constant 0 : index
    %c0_2 = arith.constant 0 : index
    %1 = vector.load %arg3[%c0_1, %c0_2] : memref<128x32xbf16, #tpu.memory_space<vmem>>, vector<128x32xbf16>
    %cst = arith.constant dense<0.000000e+00> : vector<16x32xf32>
    %2 = tpu.matmul %0, %1, %cst {dimension_numbers = #tpu.dot_dimension_numbers<[1], [0], [0], [1], [0, 0, 1, 1], [], []>} : vector<16x128xbf16>, vector<128x32xbf16>, vector<16x32xf32> -> vector<16x32xf32>
    %c0_3 = arith.constant 0 : index
    %c0_4 = arith.constant 0 : index
    %3 = vector.load %arg4[%c0_3, %c0_4] : memref<1x32xf32, #tpu.memory_space<vmem>>, vector<1x32xf32>
    %4 = vector.broadcast %3 : vector<1x32xf32> to vector<16x32xf32>
    %5 = arith.addf %2, %4 : vector<16x32xf32>
    %c0_5 = arith.constant 0 : index
    %c0_6 = arith.constant 0 : index
    %6 = vector.load %arg5[%c0_5, %c0_6] : memref<16x32xf32, #tpu.memory_space<vmem>>, vector<16x32xf32>
    %7 = arith.addf %5, %6 : vector<16x32xf32>
    %c0_7 = arith.constant 0 : index
    %c0_8 = arith.constant 0 : index
    %8 = vector.load %arg6[%c0_7, %c0_8] : memref<16x32xf32, #tpu.memory_space<vmem>>, vector<16x32xf32>
    tpu.vector_store %arg6[%c0_7, %c0_8], %7 {strides = array<i32>} : memref<16x32xf32, #tpu.memory_space<vmem>>, vector<16x32xf32>,
    return
  }
  func.func @transform_0(%arg0: i32, %arg1: i32) -> (i32, i32) {
    %c0_i32 = arith.constant 0 : i32
    %c0_i32_0 = arith.constant 0 : i32
    return %arg0, %c0_i32 : i32, i32
  }
  func.func @transform_1(%arg0: i32, %arg1: i32) -> (i32, i32) {
    %c0_i32 = arith.constant 0 : i32
    %c0_i32_0 = arith.constant 0 : i32
    return %c0_i32, %arg1 : i32, i32
  }
  func.func @transform_2(%arg0: i32, %arg1: i32) -> (i32, i32) {
    %c0_i32 = arith.constant 0 : i32
    %c0_i32_0 = arith.constant 0 : i32
    return %c0_i32, %arg1 : i32, i32
  }
  func.func @transform_3(%arg0: i32, %arg1: i32) -> (i32, i32) {
    %c0_i32 = arith.constant 0 : i32
    return %arg0, %arg1 : i32, i32
  }
  func.func @transform_4(%arg0: i32, %arg1: i32) -> (i32, i32) {
    %c0_i32 = arith.constant 0 : i32
    return %arg0, %arg1 : i32, i32
  }
}

</mosaic_0001>

<bundles_post_ra>
// kernel: clip_img_feat.12
= control target key start
LH: loop header
LB: loop body
LE: loop exit
PB: predicated region body
PF: predicated region fallthrough
CT: control target
= control target key end

     0   :  { %s643_s9 = smov 0   ;;  %s645_s10 = smov 0   ;;  %s707_s0 = inlined_call_operand.vmem [shape: f32[8,768], index: 0, kind: input, shape index: {}]   ;;  %s708_s1 = inlined_call_operand.vmem [shape: bf16[768,32], index: 1, kind: input, shape index: {}]   ;;  %s709_s2 = inlined_call_operand.vmem [shape: f32[8,32], index: 2, kind: output, shape index: {}]  }
   0x1   :  { %s647_s11 = smov 0  }
   0x2 LB: > { %s24_s12 = sadd.s32 1, %s621_s10  ;;  %p488_p0 = scmp.ge.s32.totalorder %s625_s11, 1  ;;  %s625_s11 = sphi %s647_s11, %s12_s11   ;;  %s621_s10 = sphi %s645_s10, %s711_s10   ;;  %s617_s9 = sphi %s643_s9, %s710_s9  }
   0x3   : > { %p25_p1 = scmp.ge.s32.totalorder %s24_s12, 3  ;;  %p156_p2 = scmp.lt.s32.totalorder %s625_s11, 4 }
   0x5   : > { %s713_s12 = smov (%p25_p1, %s24_s12), 0  ;;  %p157_p3 = pnand %p488_p0, %p156_p2 }
   0x6   : > { %s489_s13 = sshll.u32 (!%p157_p3), %s617_s9, 1  ;;  %s491_s14 = sshll.u32 (!%p157_p3), %s617_s9, 5 }
   0x7   : > { %160 = sbr.rel (%p157_p3) target bundleno = 194 (0xc2), region = 28  ;;  %p195_p4 = scmp.lt.s32.totalorder (!%p157_p3), %s489_s13, 5 }
   0x8   : > { %p203_p5 = scmp.lt.s32.totalorder (!%p157_p3), %s491_s14, 95  ;;  %p493_p6 = scmp.ne.s32.totalorder (!%p157_p3), %s617_s9, 0 }
   0xc   : > { %s715_s13 = smov (!%p195_p4, %s489_s13), 5  ;;  %s717_s14 = smov (!%p203_p5, %s491_s14), 95 }
   0xd   : > { %s490_s15 = sshll.u32 %s715_s13, 3  ;;  %s492_s19 = sshll.u32 %s717_s14, 2 }
   0xe   : > { %s668_s18 = scalar_lea.vmem %s707_s0, %s490_s15  ;;  %s673_s22 = scalar_lea.vmem %s708_s1, %s492_s19 }
   0xf   : > { %221 = sbr.rel (%p493_p6) target bundleno = 22 (0x16), region = 32 }
  0x14   : > { %vm222_vm0 = vcmask 261120   ;;  %v627_v0 = vmov 0.0  }
  0x15   : > { %223 = vst.msk [vmem:[#allocation2] sm:$0xff] %vm222_vm0, %v627_v0 }
  0x16 PF: > { %v569_v1 = vld [vmem:[%s673_s22 + $0x38] sm:$0xff]  ;;  %v568_v3 = vld [vmem:[%s673_s22 + $0x30] sm:$0xff]  ;;  %v567_v5 = vld [vmem:[%s673_s22 + $0x28] sm:$0xff]  ;;  %vm384_vm1 = vcmask 261120   ;;  %p558_p7 = scmp.ne.s32.totalorder %s617_s9, 2 }
  0x17   : > { %v577_v2 = vld [vmem:[%s673_s22 + $0x78] sm:$0xff]  ;;  %357 = vmatpush.bf16.msra.mxu0 %v569_v1  ;;  %v576_v4 = vld [vmem:[%s673_s22 + $0x70] sm:$0xff]  ;;  %v575_v6 = vld [vmem:[%s673_s22 + $0x68] sm:$0xff] }
  0x18   : > { %370 = vmatpush.bf16.msra.mxu1 %v577_v2  ;;  %v566_v7 = vld [vmem:[%s673_s22 + $0x20] sm:$0xff]  ;;  %v565_v9 = vld [vmem:[%s673_s22 + $0x18] sm:$0xff]  ;;  %v564_v11 = vld [vmem:[%s673_s22 + $0x10] sm:$0xff] }
  0x19   : > { %v574_v8 = vld [vmem:[%s673_s22 + $0x60] sm:$0xff]  ;;  %v573_v10 = vld [vmem:[%s673_s22 + $0x58] sm:$0xff]  ;;  %v572_v12 = vld [vmem:[%s673_s22 + $0x50] sm:$0xff] }
  0x1a   : > { %v563_v13 = vld [vmem:[%s673_s22 + $0x8] sm:$0xff]  ;;  %v562_v15 = vld [vmem:[%s673_s22] sm:$0xff] }
  0x1b   : > { %358 = vmatpush.bf16.msra.mxu0 %v568_v3  ;;  %v571_v14 = vld [vmem:[%s673_s22 + $0x48] sm:$0xff]  ;;  %v570_v16 = vld [vmem:[%s673_s22 + $0x40] sm:$0xff] }
  0x1c   : > { %371 = vmatpush.bf16.msra.mxu1 %v576_v4  ;;  %v225_v17 = vld [vmem:[%s668_s18] sm:$0xff]  ;;  %v226_v18 = vld [vmem:[%s668_s18 + $0x8] sm:$0xff] }
  0x1d   : > { %v227_v19 = vpack.c.bf16 %v225_v17, %v225_v17  ;;  %v228_v20 = vpack.c.bf16 %v226_v18, %v226_v18  ;;  %v224_v22 = vld [vmem:[#allocation2] sm:$0xff] }
  0x1f   : > { %359 = vmatpush.bf16.msra.mxu0 %v567_v5 }
  0x20   : > { %372 = vmatpush.bf16.msra.mxu1 %v575_v6 }
  0x23   : > { %360 = vmatpush.bf16.msra.mxu0 %v566_v7 }
  0x24   : > { %373 = vmatpush.bf16.msra.mxu1 %v574_v8 }
  0x27   : > { %361 = vmatpush.bf16.msra.mxu0 %v565_v9 }
  0x28   : > { %374 = vmatpush.bf16.msra.mxu1 %v573_v10 }
  0x2b   : > { %362 = vmatpush.bf16.msra.mxu0 %v564_v11 }
  0x2c   : > { %375 = vmatpush.bf16.msra.mxu1 %v572_v12 }
  0x2f   : > { %363 = vmatpush.bf16.msra.mxu0 %v563_v13 }
  0x30   : > { %376 = vmatpush.bf16.msra.mxu1 %v571_v14 }
  0x33   : > { %364 = vmatpush.bf16.msra.mxu0 %v562_v15 }
  0x34   : > { %377 = vmatpush.bf16.msra.mxu1 %v570_v16 }
  0x36   : > { %365 = vmatmul.bf16.vlgmr.msra.gmra.mxu0 %v227_v19 }
  0x37   : > { %378 = vmatmul.bf16.vlgmr.msra.gmra.mxu1 %v228_v20 }
  0xb3   : > { %v366_v21 = vpop.f32.mrf.mxu0 }
  0xb4   : > { %v379_v23 = vpop.f32.mrf.mxu1 }
  0xb5   : > { %v380_v24 = vadd.f32 %v379_v23, %v366_v21 }
  0xb7   : > { %v383_v25 = vadd.f32 %v380_v24, %v224_v22 }
  0xb8   : > { %389 = sbr.rel (%p558_p7) target bundleno = 194 (0xc2), region = 36 }
  0xb9   : > { %385 = vst.msk [vmem:[#allocation2] sm:$0xff] %vm384_vm1, %v383_v25 }
  0xbb   : > { %v368_v26 = vpop.f32.mrf.mxu0 }
  0xbc   : > { %v381_v27 = vpop.f32.mrf.mxu1 }
  0xc0   : > { %v390_v28 = vld [vmem:[#allocation2] sm:$0xff] }
  0xc1   : > { %391 = vst.msk [vmem:[%s709_s2] sm:$0xff] %vm384_vm1, %v390_v28 }
  0xc2 PF: > { %s12_s11 = sadd.s32 1, %s625_s11   ;;  %s710_s9 = smov %s621_s10 }
  0xc3   : > { %p9_p8 = scmp.ge.s32.totalorder %s12_s11, 5   ;;  %s711_s10 = smov %s713_s12 }
  0xc5   :  { %11 = sbr.rel (!%p9_p8) target bundleno = 2 (0x2), region = 69 }

// kernel: clip_img_feat.13
= control target key start
LH: loop header
LB: loop body
LE: loop exit
PB: predicated region body
PF: predicated region fallthrough
CT: control target
= control target key end

     0   :  { %vm16_vm0 = vcmask 261120   ;;  %v95_v4 = vmov 32.0   ;;  %s140_s0 = inlined_call_operand.vmem [shape: f32[16,32], index: 0, kind: input, shape index: {}]   ;;  %s141_s1 = inlined_call_operand.vmem [shape: f32[1,32], index: 1, kind: input, shape index: {}]   ;;  %s142_s2 = inlined_call_operand.vmem [shape: f32[1,32], index: 2, kind: input, shape index: {}]   ;;  %s143_s3 = inlined_call_operand.vmem [shape: f32[16,32], index: 3, kind: output, shape index: {}]  }
   0x1   :  { %v14_v0 = vld [vmem:[%s140_s0] sm:$0xff]  ;;  %v15_v2 = vld [vmem:[%s140_s0 + $0x8] sm:$0xff]  ;;  %89 = vrcp.f32 %v95_v4 }
   0x2   :  { %v17_v1 = vsel %vm16_vm0, %v14_v0, 0.0  ;;  %v20_v3 = vsel %vm16_vm0, %v15_v2, 0.0  ;;  %v87_v35 = vld [vmem:[%s141_s1] ss:$0 sm:$0xff] }
   0x3   :  { %18 = vadd.xlane.f32.xlu0 %v17_v1  ;;  %v88_v38 = vld [vmem:[%s142_s2] ss:$0 sm:$0xff] }
   0x7   :  { %v90_v5 = vpop.eup %89 }
   0x8   :  { %v24_v6 = vmul.f32 32.0, %v90_v5  ;;  %vm28_vm1 = vweird.f32 %v90_v5 }
   0xa   :  { %v25_v7 = vsub.f32 1.0, %v24_v6 }
   0xb   :  { %21 = vadd.xlane.f32.xlu0 %v20_v3 }
   0xc   :  { %v26_v8 = vmul.f32 %v90_v5, %v25_v7 }
   0xe   :  { %v27_v9 = vadd.f32 %v90_v5, %v26_v8 }
  0x10   :  { %v29_v10 = vsel %vm28_vm1, %v90_v5, %v27_v9 }
  0x76   :  { %v19_v11 = vpop.xlane.xlu0 %18 }
  0x77   :  { %v30_v12 = vmul.f32 %v29_v10, %v19_v11 }
  0x79   :  { %v32_v13 = vsub.f32 %v14_v0, %v30_v12 }
  0x7b   :  { %v34_v14 = vmul.f32 %v32_v13, %v32_v13 }
  0x7d   :  { %v36_v15 = vsel %vm16_vm0, %v34_v14, 0.0 }
  0x7e   :  { %37 = vadd.xlane.f32.xlu1 %v36_v15  ;;  %v22_v16 = vpop.xlane.xlu0 %21 }
  0x7f   :  { %v31_v17 = vmul.f32 %v29_v10, %v22_v16 }
  0x81   :  { %v33_v18 = vsub.f32 %v15_v2, %v31_v17 }
  0x83   :  { %v35_v19 = vmul.f32 %v33_v18, %v33_v18 }
  0x85   :  { %v39_v20 = vsel %vm16_vm0, %v35_v19, 0.0 }
  0x86   :  { %40 = vadd.xlane.f32.xlu1 %v39_v20 }
  0xf1   :  { %v38_v21 = vpop.xlane.xlu1 %37 }
  0xf2   :  { %v42_v22 = vmul.f32 %v38_v21, %v29_v10 }
  0xf4   :  { %v44_v23 = vadd.f32 1e-05, %v42_v22 }
  0xf6   :  { %91 = vrsqrt.f32 %v44_v23  ;;  %vm52_vm3 = vweird.f32 %v44_v23 }
  0xf9   :  { %v41_v24 = vpop.xlane.xlu1 %40 }
  0xfa   :  { %v43_v25 = vmul.f32 %v41_v24, %v29_v10 }
  0xfc   :  { %v92_v26 = vpop.eup %91  ;;  %v45_v27 = vadd.f32 1e-05, %v43_v25 }
  0xfd   :  { %v47_v28 = vmul.f32 %v92_v26, %v44_v23  ;;  %vm53_vm2 = vweird.f32 %v92_v26 }
  0xfe   :  { %93 = vrsqrt.f32 %v45_v27  ;;  %vm54_vm4 = vmor %vm52_vm3, %vm53_vm2  ;;  %vm62_vm6 = vweird.f32 %v45_v27 }
  0xff   :  { %v48_v29 = vmul.f32 %v92_v26, %v47_v28 }
 0x101   :  { %v49_v30 = vmul.f32 0.5, %v48_v29 }
 0x103   :  { %v50_v31 = vsub.f32 1.5, %v49_v30 }
 0x104   :  { %v94_v32 = vpop.eup %93 }
 0x105   :  { %v51_v33 = vmul.f32 %v92_v26, %v50_v31  ;;  %v57_v34 = vmul.f32 %v94_v32, %v45_v27  ;;  %vm63_vm5 = vweird.f32 %v94_v32 }
 0x106   :  { %vm64_vm7 = vmor %vm62_vm6, %vm63_vm5 }
 0x107   :  { %v55_v36 = vsel %vm54_vm4, %v92_v26, %v51_v33  ;;  %v58_v37 = vmul.f32 %v94_v32, %v57_v34 }
 0x108   :  { %v66_v39 = vmul.f32 %v55_v36, %v32_v13 }
 0x109   :  { %v59_v40 = vmul.f32 0.5, %v58_v37 }
 0x10a   :  { %v72_v41 = vmul.f32 %v87_v35, %v66_v39 }
 0x10b   :  { %v60_v42 = vsub.f32 1.5, %v59_v40 }
 0x10c   :  { %v78_v43 = vadd.f32 %v88_v38, %v72_v41 }
 0x10d   :  { %v61_v44 = vmul.f32 %v94_v32, %v60_v42 }
 0x10e   :  { %80 = vst.msk [vmem:[%s143_s3] sm:$0xff] %vm16_vm0, %v78_v43 }
 0x10f   :  { %v65_v45 = vsel %vm64_vm7, %v94_v32, %v61_v44 }
 0x110   :  { %v67_v46 = vmul.f32 %v65_v45, %v33_v18 }
 0x112   :  { %v73_v47 = vmul.f32 %v87_v35, %v67_v46 }
 0x114   :  { %v79_v48 = vadd.f32 %v88_v38, %v73_v47 }
 0x116   :  { %81 = vst.msk [vmem:[%s143_s3 + $0x8] sm:$0xff] %vm16_vm0, %v79_v48 }

// kernel: clip_img_feat.14
= control target key start
LH: loop header
LB: loop body
LE: loop exit
PB: predicated region body
PF: predicated region fallthrough
CT: control target
= control target key end

     0   :  { %vm27_vm0 = vcmask 261120   ;;  %v176_v4 = vmov 32.0   ;;  %vm93_vm6 = vcmask 257024   ;;  %vm143_vm9 = vcmask 781312   ;;  %s239_s0 = inlined_call_operand.vmem [shape: f32[16,32], index: 0, kind: input, shape index: {}]   ;;  %s240_s1 = inlined_call_operand.vmem [shape: f32[1,32], index: 1, kind: input, shape index: {}]   ;;  %s241_s2 = inlined_call_operand.vmem [shape: f32[1,32], index: 2, kind: input, shape index: {}]   ;;  %s242_s4 = inlined_call_operand.vmem [shape: f32[1,96], index: 4, kind: input, shape index: {}]   ;;  %s243_s3 = inlined_call_operand.vmem [shape: bf16[32,96], index: 3, kind: input, shape index: {}]   ;;  %s244_s5 = inlined_call_operand.vmem [shape: bf16[16,96], index: 5, kind: output, shape index: {}]  }
   0x1   :  { %v25_v0 = vld [vmem:[%s239_s0] sm:$0xff]  ;;  %v26_v2 = vld [vmem:[%s239_s0 + $0x8] sm:$0xff]  ;;  %170 = vrcp.f32 %v176_v4 }
   0x2   :  { %v28_v1 = vsel %vm27_vm0, %v25_v0, 0.0  ;;  %v31_v3 = vsel %vm27_vm0, %v26_v2, 0.0  ;;  %v165_v24 = vld [vmem:[%s243_s3 + $0x8] sm:$0xff]  ;;  %v164_v27 = vld [vmem:[%s243_s3] sm:$0xff] }
   0x3   :  { %29 = vadd.xlane.f32.xlu0 %v28_v1  ;;  %133 = vmatpush.bf16.msra.mxu0 %v165_v24  ;;  %v167_v37 = vld [vmem:[%s240_s1] ss:$0 sm:$0xff] }
   0x4   :  { %v168_v40 = vld [vmem:[%s241_s2] ss:$0 sm:$0xff] }
   0x5   :  { %v169_v54 = vld [vmem:[%s242_s4] ss:$0 sm:$0xff] }
   0x7   :  { %v171_v5 = vpop.eup %170  ;;  %134 = vmatpush.bf16.msra.mxu0 %v164_v27 }
   0x8   :  { %v35_v6 = vmul.f32 32.0, %v171_v5  ;;  %vm39_vm1 = vweird.f32 %v171_v5 }
   0xa   :  { %v36_v7 = vsub.f32 1.0, %v35_v6 }
   0xb   :  { %32 = vadd.xlane.f32.xlu0 %v31_v3 }
   0xc   :  { %v37_v8 = vmul.f32 %v171_v5, %v36_v7 }
   0xe   :  { %v38_v9 = vadd.f32 %v171_v5, %v37_v8 }
  0x10   :  { %v40_v10 = vsel %vm39_vm1, %v171_v5, %v38_v9 }
  0x76   :  { %v30_v11 = vpop.xlane.xlu0 %29 }
  0x77   :  { %v41_v12 = vmul.f32 %v40_v10, %v30_v11 }
  0x79   :  { %v43_v13 = vsub.f32 %v25_v0, %v41_v12 }
  0x7b   :  { %v45_v14 = vmul.f32 %v43_v13, %v43_v13 }
  0x7d   :  { %v47_v15 = vsel %vm27_vm0, %v45_v14, 0.0 }
  0x7e   :  { %48 = vadd.xlane.f32.xlu1 %v47_v15  ;;  %v33_v16 = vpop.xlane.xlu0 %32 }
  0x7f   :  { %v42_v17 = vmul.f32 %v40_v10, %v33_v16 }
  0x81   :  { %v44_v18 = vsub.f32 %v26_v2, %v42_v17 }
  0x83   :  { %v46_v19 = vmul.f32 %v44_v18, %v44_v18 }
  0x85   :  { %v50_v20 = vsel %vm27_vm0, %v46_v19, 0.0 }
  0x86   :  { %51 = vadd.xlane.f32.xlu1 %v50_v20 }
  0xf1   :  { %v49_v21 = vpop.xlane.xlu1 %48 }
  0xf2   :  { %v53_v22 = vmul.f32 %v49_v21, %v40_v10 }
  0xf4   :  { %v55_v23 = vadd.f32 1e-05, %v53_v22 }
  0xf6   :  { %172 = vrsqrt.f32 %v55_v23  ;;  %vm63_vm3 = vweird.f32 %v55_v23 }
  0xf9   :  { %v52_v25 = vpop.xlane.xlu1 %51 }
  0xfa   :  { %v54_v26 = vmul.f32 %v52_v25, %v40_v10 }
  0xfc   :  { %v173_v28 = vpop.eup %172  ;;  %v56_v29 = vadd.f32 1e-05, %v54_v26 }
  0xfd   :  { %v58_v30 = vmul.f32 %v173_v28, %v55_v23  ;;  %vm64_vm2 = vweird.f32 %v173_v28 }
  0xfe   :  { %174 = vrsqrt.f32 %v56_v29  ;;  %vm65_vm4 = vmor %vm63_vm3, %vm64_vm2  ;;  %vm73_vm7 = vweird.f32 %v56_v29 }
  0xff   :  { %v59_v31 = vmul.f32 %v173_v28, %v58_v30 }
 0x101   :  { %v60_v32 = vmul.f32 0.5, %v59_v31 }
 0x103   :  { %v61_v33 = vsub.f32 1.5, %v60_v32 }
 0x104   :  { %v175_v34 = vpop.eup %174 }
 0x105   :  { %v62_v35 = vmul.f32 %v173_v28, %v61_v33  ;;  %v68_v36 = vmul.f32 %v175_v34, %v56_v29  ;;  %vm74_vm5 = vweird.f32 %v175_v34 }
 0x106   :  { %vm75_vm8 = vmor %vm73_vm7, %vm74_vm5 }
 0x107   :  { %v66_v38 = vsel %vm65_vm4, %v173_v28, %v62_v35  ;;  %v69_v39 = vmul.f32 %v175_v34, %v68_v36 }
 0x108   :  { %v77_v41 = vmul.f32 %v66_v38, %v43_v13 }
 0x109   :  { %v70_v42 = vmul.f32 0.5, %v69_v39 }
 0x10a   :  { %v83_v43 = vmul.f32 %v167_v37, %v77_v41 }
 0x10b   :  { %v71_v44 = vsub.f32 1.5, %v70_v42 }
 0x10c   :  { %v89_v45 = vadd.f32 %v168_v40, %v83_v43 }
 0x10d   :  { %v72_v46 = vmul.f32 %v175_v34, %v71_v44 }
 0x10e   :  { %v91_v47 = vpack.c.bf16 %v89_v45, %v89_v45 }
 0x10f   :  { %v76_v48 = vsel %vm75_vm8, %v175_v34, %v72_v46 }
 0x110   :  { %94 = vst.msk [vmem:[#allocation2] sm:$0xf] %vm93_vm6, %v91_v47  ;;  %v78_v49 = vmul.f32 %v76_v48, %v44_v18 }
 0x112   :  { %v84_v50 = vmul.f32 %v167_v37, %v78_v49 }
 0x114   :  { %v90_v51 = vadd.f32 %v168_v40, %v84_v50 }
 0x116   :  { %v92_v52 = vpack.c.bf16 %v90_v51, %v90_v51 }
 0x118   :  { %95 = vst.msk [vmem:[#allocation2 + $0x4] sm:$0xf] %vm93_vm6, %v92_v52 }
 0x11f   :  { %v163_v53 = vld [vmem:[#allocation2] sm:$0xff] }
 0x120   :  { %162 = vmatmul.msk.bf16.vlgmr.msra.gmra.mxu0 %vm27_vm0, %v163_v53 }
 0x19d   :  { %v136_v55 = vpop.f32.mrf.mxu0 }
 0x19e   :  { %v137_v56 = vadd.f32 %v169_v54, %v136_v55 }
 0x1a0   :  { %v141_v57 = vpack.c.bf16 %v137_v56, %v137_v56 }
 0x1a2   :  { %144 = vst.msk [vmem:[%s244_s5] sm:$0xf] %vm143_vm9, %v141_v57 }
 0x1a5   :  { %v138_v58 = vpop.f32.mrf.mxu0 }
 0x1a6   :  { %v139_v59 = vadd.f32 %v169_v54, %v138_v58 }
 0x1a8   :  { %v142_v60 = vpack.c.bf16 %v139_v59, %v139_v59 }
 0x1aa   :  { %145 = vst.msk [vmem:[%s244_s5 + $0x4] sm:$0xf] %vm143_vm9, %v142_v60 }

// kernel: clip_img_feat.15
= control target key start
LH: loop header
LB: loop body
LE: loop exit
PB: predicated region body
PF: predicated region fallthrough
CT: control target
= control target key end

     0   :  { %s524_s6 = smov 0   ;;  %s599_s0 = inlined_call_operand.vmem [shape: bf16[2,8,96], index: 0, kind: input, shape index: {}]   ;;  %s600_s1 = inlined_call_operand.vmem [shape: bf16[2,8,32], index: 1, kind: output, shape index: {}]  }
   0x1 LB: > { %s437_s7 = sadd.s32 4294967295, %s498_s6   ;;  %p441_p0 = scmp.ge.s32.totalorder %s498_s6, 1  ;;  %s498_s6 = sphi %s524_s6, %s11_s6  }
   0x2   : > { %p86_p1 = scmp.lt.s32.totalorder %s498_s6, 3 }
   0x4   : > { %p87_p2 = pnand %p441_p0, %p86_p1 }
   0x5   : > { %p104_p3 = scmp.lt.s32.totalorder (!%p87_p2), %s437_s7, 1  ;;  %s500_s12 = smov (!%p87_p2), 96  }
   0x6   : > { %90 = sbr.rel (%p87_p2) target bundleno = 1194 (0x4aa), region = 24  ;;  %s501_s13 = smov (!%p87_p2), 88  }
   0x7   : > { %s502_s14 = smov (!%p87_p2), 120   ;;  %s503_s15 = smov (!%p87_p2), 64  }
   0x8   : > { %s504_s16 = smov (!%p87_p2), 80   ;;  %s505_s17 = smov (!%p87_p2), 72  }
   0x9   : > { %s506_s18 = smov (!%p87_p2), 112   ;;  %s507_s19 = smov (!%p87_p2), 104  }
   0xa   : > { %s508_s20 = smov (!%p87_p2), 56   ;;  %s509_s21 = smov (!%p87_p2), 40  }
   0xb   : > { %s602_s7 = smov (!%p104_p3, %s437_s7), 1  ;;  %vm119_vm0 = vcmask 64512   ;;  %v139_v17 = vlaneseq  ;;  %vm160_vm2 = vcmask 1043456   ;;  %vm178_vm3 = vcmask 60416   ;;  %s510_s25 = smov 48  }
   0xc   : > { %s442_s8 = sshll.u32 %s602_s7, 2  ;;  %s511_s26 = smov 8   ;;  %vm246_vm4 = vcmask 126016   ;;  %vm314_vm5 = vcmask 191616   ;;  %vm382_vm6 = vcmask 257216  }
   0xd   : > { %s107_s11 = scalar_lea.vmem %s599_s0, %s442_s8  ;;  %v551_v18 = vand.u32 127, %v139_v17  ;;  %s577_s24 = scalar_lea.vmem %s600_s1, %s442_s8 }
   0xe   : > { %v113_v0 = vld [vmem:[%s107_s11] sm:$0xf]  ;;  %s512_s27 = smov 16   ;;  %s513_s28 = smov 24  }
   0xf   : > { %v115_v1 = vunpack.c.l.b16 %v113_v0  ;;  %v180_v3 = vld [vmem:[%s107_s11] sm:$0xf]  ;;  %vm141_vm1 = vcmp.lt.s32.totalorder %v551_v18, 5 }
  0x10   : > { %v182_v4 = vunpack.c.l.b16 %v180_v3  ;;  %v248_v8 = vld [vmem:[%s107_s11] sm:$0xf] }
  0x11   : > { %v116_v2 = vpack.c.b16 %v115_v1, %v115_v1  ;;  %v250_v10 = vunpack.c.l.b16 %v248_v8  ;;  %v316_v12 = vld [vmem:[%s107_s11] sm:$0xf] }
  0x12   : > { %v540_v5 = vpack.c.b16 %v182_v4, %v182_v4  ;;  %v318_v14 = vunpack.c.l.b16 %v316_v12 }
  0x13   : > { %117 = vrot.lane.b32.xlu0 %v116_v2, %s500_s12  ;;  %v547_v13 = vpack.c.b16 %v250_v10, %v250_v10 }
  0x14   : > { %186 = vrot.lane.b32.xlu1 %v540_v5, %s501_s13  ;;  %184 = vrot.lane.b32.xlu2 %v540_v5, %s502_s14  ;;  %v319_v16 = vpack.c.b16 %v318_v14, %v318_v14 }
  0x1c   : > { %155 = vrot.lane.b32.xlu2 %v116_v2, %s503_s15 }
  0x24   : > { %254 = vrot.lane.b32.xlu2 %v547_v13, %s504_s16 }
  0x2c   : > { %322 = vrot.lane.b32.xlu2 %v319_v16, %s505_s17 }
  0x34   : > { %252 = vrot.lane.b32.xlu2 %v547_v13, %s506_s18 }
  0x3c   : > { %320 = vrot.lane.b32.xlu2 %v319_v16, %s507_s19 }
  0x6e   : > { %v185_v15 = vpop.permute.xlu2 %184 }
  0x76   : > { %v156_v23 = vpop.permute.xlu2 %155 }
  0x77   : > { %v162_v28 = vsel %vm160_vm2, %v156_v23, 0 }
  0x78   : > { %171 = vmatpush.bf16.msra.mxu1 %v162_v28 }
  0x7e   : > { %v255_v24 = vpop.permute.xlu2 %254 }
  0x7f   : > { %v260_v26 = vsel %vm119_vm0, %v255_v24, 0 }
  0x80   : > { %269 = vmatpush.bf16.xpose.msrb.mxu1 %v260_v26 }
  0x85   : > { %v118_v6 = vpop.permute.xlu0 %117 }
  0x86   : > { %v124_v7 = vsel %vm119_vm0, %v118_v6, 0  ;;  %v187_v9 = vpop.permute.xlu1 %186  ;;  %v323_v25 = vpop.permute.xlu2 %322 }
  0x87   : > { %133 = vmatpush.bf16.xpose.msra.mxu0 %v124_v7  ;;  %v192_v11 = vsel %vm119_vm0, %v187_v9, 0  ;;  %v328_v27 = vsel %vm119_vm0, %v323_v25, 0 }
  0x88   : > { %201 = vmatpush.bf16.xpose.msra.mxu2 %v192_v11 }
  0x8e   : > { %444 = vmatmul.msk.bf16.vlgmr.msra.gmra.mxu0 %vm119_vm0, %v113_v0  ;;  %v253_v29 = vpop.permute.xlu2 %252 }
  0x8f   : > { %446 = vmatmul.msk.bf16.vlgmr.msra.gmra.mxu2 %vm119_vm0, %v185_v15  ;;  %337 = vmatpush.bf16.xpose.msrb.mxu0 %v328_v27 }
  0x96   : > { %v321_v30 = vpop.permute.xlu2 %320 }
  0x9e   : > { %450 = vmatmul.msk.bf16.vlgmr.msrb.gmra.mxu0 %vm119_vm0, %v321_v30 }
 0x10b   : > { %v135_v19 = vpop.f32.mrf.mxu0 }
 0x10c   : > { %v142_v20 = vsel %vm141_vm1, %v135_v19, -1e+30 }
 0x10d   : > { %v143_v21 = vsel %vm119_vm0, %v142_v20, -inf }
 0x10e   : > { %144 = vmax.xlane.f32.xlu0 %v143_v21 }
 0x112   : > { %v203_v31 = vpop.f32.mrf.mxu2 }
 0x113   : > { %v137_v22 = vpop.f32.mrf.mxu0  ;;  %v207_v32 = vsel %vm141_vm1, %v203_v31, -1e+30 }
 0x114   : > { %v208_v34 = vsel %vm119_vm0, %v207_v32, -inf }
 0x115   : > { %209 = vmax.xlane.f32.xlu2 %v208_v34 }
 0x11a   : > { %v205_v37 = vpop.f32.mrf.mxu2 }
 0x11b   : > { %v339_v40 = vpop.f32.mrf.mxu0 }
 0x11c   : > { %v343_v41 = vsel %vm141_vm1, %v339_v40, -1e+30 }
 0x11d   : > { %v344_v42 = vsel %vm119_vm0, %v343_v41, -inf }
 0x123   : > { %v341_v44 = vpop.f32.mrf.mxu0 }
 0x181   : > { %v145_v33 = vpop.xlane.xlu0 %144 }
 0x182   : > { %v146_v35 = vsub.f32 %v142_v20, %v145_v33 }
 0x184   : > { %v147_v36 = vmul.f32 1.442695, %v146_v35 }
 0x186   : > { %476 = vpow2.f32 %v147_v36 }
 0x188   : > { %v210_v50 = vpop.xlane.xlu2 %209 }
 0x189   : > { %v211_v52 = vsub.f32 %v207_v32, %v210_v50 }
 0x18b   : > { %v212_v53 = vmul.f32 1.442695, %v211_v52 }
 0x18c   : > { %v477_v38 = vpop.eup %476 }
 0x18d   : > { %v149_v39 = vsel %vm119_vm0, %v477_v38, 0.0 }
 0x18e   : > { %150 = vadd.xlane.f32.xlu1 %v149_v39 }
 0x196   : > { %345 = vmax.xlane.f32.xlu1 %v344_v42 }
 0x1af   : > { %220 = vrot.lane.b32.xlu1 %v540_v5, %s508_s20 }
 0x1b7   : > { %356 = vrot.lane.b32.xlu1 %v319_v16, %s509_s21 }
 0x201   : > { %v151_v43 = vpop.xlane.xlu1 %150 }
 0x202   : > { %478 = vrcp.f32 %v151_v43 }
 0x203   : > { %480 = vpow2.f32 %v212_v53 }
 0x208   : > { %v479_v45 = vpop.eup %478 }
 0x209   : > { %v153_v46 = vmul.f32 %v479_v45, %v477_v38  ;;  %v346_v54 = vpop.xlane.xlu1 %345  ;;  %v481_v60 = vpop.eup %480 }
 0x20a   : > { %v347_v56 = vsub.f32 %v343_v41, %v346_v54  ;;  %v214_v62 = vsel %vm119_vm0, %v481_v60, 0.0 }
 0x20b   : > { %v154_v47 = vpack.c.bf16 %v153_v46, %v153_v46 }
 0x20c   : > { %v348_v59 = vmul.f32 1.442695, %v347_v56 }
 0x20d   : > { %445 = vmatmul.msk.bf16.vlgmr.msra.gmra.mxu1 %vm119_vm0, %v154_v47 }
 0x20e   : > { %482 = vpow2.f32 %v348_v59 }
 0x214   : > { %v483_v63 = vpop.eup %482 }
 0x215   : > { %v350_v0 = vsel %vm119_vm0, %v483_v63, 0.0 }
 0x21d   : > { %448 = vmatmul.msk.bf16.vlgmr.msrb.gmra.mxu1 %vm119_vm0, %v253_v29 }
 0x221   : > { %v221_v1 = vpop.permute.xlu1 %220 }
 0x222   : > { %v226_v2 = vsel %vm160_vm2, %v221_v1, 0 }
 0x223   : > { %235 = vmatpush.bf16.msra.mxu3 %v226_v2 }
 0x229   : > { %v357_v3 = vpop.permute.xlu1 %356 }
 0x22a   : > { %v362_v4 = vsel %vm160_vm2, %v357_v3, 0 }
 0x22b   : > { %371 = vmatpush.bf16.msrb.mxu2 %v362_v4 }
 0x28a   : > { %v173_v48 = vpop.f32.mrf.mxu1 }
 0x28b   : > { %v177_v49 = vpack.c.bf16 %v173_v48, %v173_v48 }
 0x28d   : > { %179 = vst.msk [vmem:[%s577_s24] sm:$0xf] %vm178_vm3, %v177_v49 }
 0x292   : > { %v175_v51 = vpop.f32.mrf.mxu1 }
 0x29a   : > { %v271_v55 = vpop.f32.mrf.mxu1 }
 0x29b   : > { %v275_v57 = vsel %vm141_vm1, %v271_v55, -1e+30 }
 0x29c   : > { %v276_v58 = vsel %vm119_vm0, %v275_v57, -inf }
 0x29d   : > { %277 = vmax.xlane.f32.xlu0 %v276_v58 }
 0x2a2   : > { %v273_v61 = vpop.f32.mrf.mxu1 }
 0x2a5   : > { %215 = vadd.xlane.f32.xlu0 %v214_v62 }
 0x2ad   : > { %351 = vadd.xlane.f32.xlu0 %v350_v0 }
 0x310   : > { %v278_v5 = vpop.xlane.xlu0 %277 }
 0x311   : > { %v279_v6 = vsub.f32 %v275_v57, %v278_v5 }
 0x313   : > { %v280_v7 = vmul.f32 1.442695, %v279_v6 }
 0x315   : > { %484 = vpow2.f32 %v280_v7 }
 0x318   : > { %v216_v8 = vpop.xlane.xlu0 %215 }
 0x319   : > { %486 = vrcp.f32 %v216_v8 }
 0x31b   : > { %v485_v9 = vpop.eup %484 }
 0x31c   : > { %v282_v10 = vsel %vm119_vm0, %v485_v9, 0.0 }
 0x31d   : > { %283 = vadd.xlane.f32.xlu0 %v282_v10 }
 0x31f   : > { %v487_v11 = vpop.eup %486 }
 0x320   : > { %v352_v12 = vpop.xlane.xlu0 %351  ;;  %v218_v14 = vmul.f32 %v487_v11, %v481_v60 }
 0x321   : > { %488 = vrcp.f32 %v352_v12 }
 0x322   : > { %v219_v15 = vpack.c.bf16 %v218_v14, %v218_v14 }
 0x324   : > { %447 = vmatmul.msk.bf16.vlgmr.msra.gmra.mxu3 %vm119_vm0, %v219_v15 }
 0x327   : > { %v489_v16 = vpop.eup %488 }
 0x328   : > { %v354_v17 = vmul.f32 %v489_v16, %v483_v63 }
 0x32a   : > { %v355_v18 = vpack.c.bf16 %v354_v17, %v354_v17 }
 0x32c   : > { %451 = vmatmul.msk.bf16.vlgmr.msrb.gmra.mxu2 %vm119_vm0, %v355_v18 }
 0x331   : > { %288 = vrot.lane.b32.xlu0 %v547_v13, %s510_s25 }
 0x390   : > { %v284_v19 = vpop.xlane.xlu0 %283 }
 0x391   : > { %490 = vrcp.f32 %v284_v19 }
 0x397   : > { %v491_v20 = vpop.eup %490 }
 0x398   : > { %v286_v21 = vmul.f32 %v491_v20, %v485_v9 }
 0x39a   : > { %v287_v24 = vpack.c.bf16 %v286_v21, %v286_v21 }
 0x3a3   : > { %v289_v22 = vpop.permute.xlu0 %288 }
 0x3a4   : > { %v294_v23 = vsel %vm160_vm2, %v289_v22, 0 }
 0x3a5   : > { %303 = vmatpush.bf16.msrb.mxu3 %v294_v23 }
 0x3a7   : > { %v237_v25 = vpop.f32.mrf.mxu3 }
 0x3a8   : > { %v241_v26 = vpack.c.bf16 %v237_v25, %v237_v25  ;;  %449 = vmatmul.msk.bf16.vlgmr.msrb.gmra.mxu3 %vm119_vm0, %v287_v24 }
 0x3aa   : > { %243 = vrot.lane.b32.xlu2 %v241_v26, %s511_s26 }
 0x3af   : > { %v239_v27 = vpop.f32.mrf.mxu3  ;;  %v373_v28 = vpop.f32.mrf.mxu2 }
 0x3b0   : > { %v377_v33 = vpack.c.bf16 %v373_v28, %v373_v28 }
 0x3b7   : > { %v375_v13 = vpop.f32.mrf.mxu2 }
 0x404   : > { %v244_v29 = vpop.permute.xlu2 %243 }
 0x405   : > { %247 = vst.msk [vmem:[%s577_s24] sm:$0xf] %vm246_vm4, %v244_v29 }
 0x42b   : > { %v305_v30 = vpop.f32.mrf.mxu3 }
 0x42c   : > { %v309_v31 = vpack.c.bf16 %v305_v30, %v305_v30 }
 0x42e   : > { %311 = vrot.lane.b32.xlu1 %v309_v31, %s512_s27 }
 0x433   : > { %v307_v32 = vpop.f32.mrf.mxu3 }
 0x436   : > { %379 = vrot.lane.b32.xlu1 %v377_v33, %s513_s28 }
 0x4a0   : > { %v312_v34 = vpop.permute.xlu1 %311 }
 0x4a1   : > { %315 = vst.msk [vmem:[%s577_s24] sm:$0xf] %vm314_vm5, %v312_v34 }
 0x4a8   : > { %v380_v35 = vpop.permute.xlu1 %379 }
 0x4a9   : > { %383 = vst.msk [vmem:[%s577_s24] sm:$0xf] %vm382_vm6, %v380_v35 }
 0x4aa PF: > { %s11_s6 = sadd.s32 1, %s498_s6  }
 0x4ab   : > { %p8_p4 = scmp.ge.s32.totalorder %s11_s6, 4  }
 0x4ad   :  { %10 = sbr.rel (!%p8_p4) target bundleno = 1 (0x1), region = 54 }

// kernel: clip_img_feat.16
= control target key start
LH: loop header
LB: loop body
LE: loop exit
PB: predicated region body
PF: predicated region fallthrough
CT: control target
= control target key end

     0   :  { %vm45_vm0 = vcmask 261120   ;;  %s139_s1 = inlined_call_operand.vmem [shape: bf16[32,32], index: 1, kind: input, shape index: {}]   ;;  %s140_s2 = inlined_call_operand.vmem [shape: f32[1,32], index: 2, kind: input, shape index: {}]   ;;  %s141_s0 = inlined_call_operand.vmem [shape: bf16[16,32], index: 0, kind: input, shape index: {}]   ;;  %s142_s3 = inlined_call_operand.vmem [shape: f32[16,32], index: 3, kind: input, shape index: {}]   ;;  %s143_s4 = inlined_call_operand.vmem [shape: f32[16,32], index: 4, kind: output, shape index: {}]  }
   0x1   :  { %v88_v0 = vld [vmem:[%s139_s1 + $0x8] sm:$0xff]  ;;  %v87_v1 = vld [vmem:[%s139_s1] sm:$0xff] }
   0x2   :  { %55 = vmatpush.bf16.msra.mxu0 %v88_v0  ;;  %v86_v2 = vld [vmem:[%s141_s0] sm:$0xff]  ;;  %v64_v9 = vld [vmem:[%s142_s3 + $0x8] sm:$0xff] }
   0x3   :  { %v89_v3 = vld [vmem:[%s140_s2] ss:$0 sm:$0xff] }
   0x4   :  { %v63_v5 = vld [vmem:[%s142_s3] sm:$0xff] }
   0x6   :  { %56 = vmatpush.bf16.msra.mxu0 %v87_v1 }
   0x9   :  { %85 = vmatmul.msk.bf16.vlgmr.msra.gmra.mxu0 %vm45_vm0, %v86_v2 }
  0x86   :  { %v58_v4 = vpop.f32.mrf.mxu0 }
  0x87   :  { %v59_v6 = vadd.f32 %v89_v3, %v58_v4 }
  0x89   :  { %v65_v7 = vadd.f32 %v63_v5, %v59_v6 }
  0x8b   :  { %67 = vst.msk [vmem:[%s143_s4] sm:$0xff] %vm45_vm0, %v65_v7 }
  0x8e   :  { %v60_v8 = vpop.f32.mrf.mxu0 }
  0x8f   :  { %v61_v10 = vadd.f32 %v89_v3, %v60_v8 }
  0x91   :  { %v66_v11 = vadd.f32 %v64_v9, %v61_v10 }
  0x93   :  { %68 = vst.msk [vmem:[%s143_s4 + $0x8] sm:$0xff] %vm45_vm0, %v66_v11 }

// kernel: clip_img_feat.17
= control target key start
LH: loop header
LB: loop body
LE: loop exit
PB: predicated region body
PF: predicated region fallthrough
CT: control target
= control target key end

     0   :  { %vm27_vm0 = vcmask 261120   ;;  %v232_v4 = vmov 32.0   ;;  %vm93_vm6 = vcmask 257024   ;;  %s292_s0 = inlined_call_operand.vmem [shape: f32[16,32], index: 0, kind: input, shape index: {}]   ;;  %s293_s1 = inlined_call_operand.vmem [shape: f32[1,32], index: 1, kind: input, shape index: {}]   ;;  %s294_s2 = inlined_call_operand.vmem [shape: f32[1,32], index: 2, kind: input, shape index: {}]   ;;  %s295_s4 = inlined_call_operand.vmem [shape: f32[1,128], index: 4, kind: input, shape index: {}]   ;;  %s296_s3 = inlined_call_operand.vmem [shape: bf16[32,128], index: 3, kind: input, shape index: {}]   ;;  %s297_s5 = inlined_call_operand.vmem [shape: bf16[16,128], index: 5, kind: output, shape index: {}]  }
   0x1   :  { %v25_v0 = vld [vmem:[%s292_s0] sm:$0xff]  ;;  %v26_v2 = vld [vmem:[%s292_s0 + $0x8] sm:$0xff]  ;;  %218 = vrcp.f32 %v232_v4 }
   0x2   :  { %v28_v1 = vsel %vm27_vm0, %v25_v0, 0.0  ;;  %v31_v3 = vsel %vm27_vm0, %v26_v2, 0.0  ;;  %v208_v24 = vld [vmem:[%s296_s3 + $0x8] sm:$0xff]  ;;  %v207_v27 = vld [vmem:[%s296_s3] sm:$0xff] }
   0x3   :  { %29 = vadd.xlane.f32.xlu0 %v28_v1  ;;  %133 = vmatpush.bf16.msra.mxu0 %v208_v24  ;;  %v215_v37 = vld [vmem:[%s293_s1] ss:$0 sm:$0xff] }
   0x4   :  { %v216_v40 = vld [vmem:[%s294_s2] ss:$0 sm:$0xff] }
   0x5   :  { %v217_v54 = vld [vmem:[%s295_s4] ss:$0 sm:$0xff] }
   0x7   :  { %v219_v5 = vpop.eup %218  ;;  %134 = vmatpush.bf16.msra.mxu0 %v207_v27 }
   0x8   :  { %v35_v6 = vmul.f32 32.0, %v219_v5  ;;  %vm39_vm1 = vweird.f32 %v219_v5 }
   0xa   :  { %v36_v7 = vsub.f32 1.0, %v35_v6 }
   0xb   :  { %32 = vadd.xlane.f32.xlu0 %v31_v3 }
   0xc   :  { %v37_v8 = vmul.f32 %v219_v5, %v36_v7 }
   0xe   :  { %v38_v9 = vadd.f32 %v219_v5, %v37_v8 }
  0x10   :  { %v40_v10 = vsel %vm39_vm1, %v219_v5, %v38_v9 }
  0x76   :  { %v30_v11 = vpop.xlane.xlu0 %29 }
  0x77   :  { %v41_v12 = vmul.f32 %v40_v10, %v30_v11 }
  0x79   :  { %v43_v13 = vsub.f32 %v25_v0, %v41_v12 }
  0x7b   :  { %v45_v14 = vmul.f32 %v43_v13, %v43_v13 }
  0x7d   :  { %v47_v15 = vsel %vm27_vm0, %v45_v14, 0.0 }
  0x7e   :  { %48 = vadd.xlane.f32.xlu1 %v47_v15  ;;  %v33_v16 = vpop.xlane.xlu0 %32 }
  0x7f   :  { %v42_v17 = vmul.f32 %v40_v10, %v33_v16 }
  0x81   :  { %v44_v18 = vsub.f32 %v26_v2, %v42_v17 }
  0x83   :  { %v46_v19 = vmul.f32 %v44_v18, %v44_v18 }
  0x85   :  { %v50_v20 = vsel %vm27_vm0, %v46_v19, 0.0 }
  0x86   :  { %51 = vadd.xlane.f32.xlu1 %v50_v20 }
  0xf1   :  { %v49_v21 = vpop.xlane.xlu1 %48 }
  0xf2   :  { %v53_v22 = vmul.f32 %v49_v21, %v40_v10 }
  0xf4   :  { %v55_v23 = vadd.f32 1e-05, %v53_v22 }
  0xf6   :  { %220 = vrsqrt.f32 %v55_v23  ;;  %vm63_vm3 = vweird.f32 %v55_v23 }
  0xf9   :  { %v52_v25 = vpop.xlane.xlu1 %51 }
  0xfa   :  { %v54_v26 = vmul.f32 %v52_v25, %v40_v10 }
  0xfc   :  { %v221_v28 = vpop.eup %220  ;;  %v56_v29 = vadd.f32 1e-05, %v54_v26 }
  0xfd   :  { %v58_v30 = vmul.f32 %v221_v28, %v55_v23  ;;  %vm64_vm2 = vweird.f32 %v221_v28 }
  0xfe   :  { %222 = vrsqrt.f32 %v56_v29  ;;  %vm65_vm4 = vmor %vm63_vm3, %vm64_vm2  ;;  %vm73_vm7 = vweird.f32 %v56_v29 }
  0xff   :  { %v59_v31 = vmul.f32 %v221_v28, %v58_v30 }
 0x101   :  { %v60_v32 = vmul.f32 0.5, %v59_v31 }
 0x103   :  { %v61_v33 = vsub.f32 1.5, %v60_v32 }
 0x104   :  { %v223_v34 = vpop.eup %222 }
 0x105   :  { %v62_v35 = vmul.f32 %v221_v28, %v61_v33  ;;  %v68_v36 = vmul.f32 %v223_v34, %v56_v29  ;;  %vm74_vm5 = vweird.f32 %v223_v34 }
 0x106   :  { %vm75_vm8 = vmor %vm73_vm7, %vm74_vm5 }
 0x107   :  { %v66_v38 = vsel %vm65_vm4, %v221_v28, %v62_v35  ;;  %v69_v39 = vmul.f32 %v223_v34, %v68_v36 }
 0x108   :  { %v77_v41 = vmul.f32 %v66_v38, %v43_v13 }
 0x109   :  { %v70_v42 = vmul.f32 0.5, %v69_v39 }
 0x10a   :  { %v83_v43 = vmul.f32 %v215_v37, %v77_v41 }
 0x10b   :  { %v71_v44 = vsub.f32 1.5, %v70_v42 }
 0x10c   :  { %v89_v45 = vadd.f32 %v216_v40, %v83_v43 }
 0x10d   :  { %v72_v46 = vmul.f32 %v223_v34, %v71_v44 }
 0x10e   :  { %v91_v47 = vpack.c.bf16 %v89_v45, %v89_v45 }
 0x10f   :  { %v76_v48 = vsel %vm75_vm8, %v223_v34, %v72_v46 }
 0x110   :  { %94 = vst.msk [vmem:[#allocation2] sm:$0xf] %vm93_vm6, %v91_v47  ;;  %v78_v49 = vmul.f32 %v76_v48, %v44_v18 }
 0x112   :  { %v84_v50 = vmul.f32 %v215_v37, %v78_v49 }
 0x114   :  { %v90_v51 = vadd.f32 %v216_v40, %v84_v50 }
 0x116   :  { %v92_v52 = vpack.c.bf16 %v90_v51, %v90_v51 }
 0x118   :  { %95 = vst.msk [vmem:[#allocation2 + $0x4] sm:$0xf] %vm93_vm6, %v92_v52 }
 0x11f   :  { %v206_v53 = vld [vmem:[#allocation2] sm:$0xff] }
 0x120   :  { %203 = vmatmul.msk.bf16.vlgmr.msra.gmra.mxu0 %vm27_vm0, %v206_v53 }
 0x19d   :  { %v136_v55 = vpop.f32.mrf.mxu0 }
 0x19e   :  { %v137_v56 = vadd.f32 %v217_v54, %v136_v55 }
 0x1a0   :  { %v204_v57 = vmul.f32 -1.702, %v137_v56 }
 0x1a2   :  { %v145_v58 = vmul.f32 1.442695, %v204_v57 }
 0x1a4   :  { %224 = vpow2.f32 %v145_v58 }
 0x1a5   :  { %v138_v59 = vpop.f32.mrf.mxu0 }
 0x1a6   :  { %v139_v60 = vadd.f32 %v217_v54, %v138_v59 }
 0x1a8   :  { %v205_v61 = vmul.f32 -1.702, %v139_v60 }
 0x1aa   :  { %v225_v62 = vpop.eup %224  ;;  %v147_v63 = vmul.f32 1.442695, %v205_v61 }
 0x1ab   :  { %v149_v0 = vadd.f32 1.0, %v225_v62 }
 0x1ac   :  { %226 = vpow2.f32 %v147_v63 }
 0x1ad   :  { %228 = vrcp.f32 %v149_v0  ;;  %v162_v10 = vand.u32 2147483648, %v149_v0  ;;  %vm156_vm10 = vweird.f32 %v149_v0  ;;  %v160_v11 = vand.u32 2147483647, %v149_v0 }
 0x1af   :  { %v163_v17 = vor.u32 1.1754944e-38, %v162_v10  ;;  %vm161_vm13 = vcmp.eq.f32.partialorder %v160_v11, 8.507059e+37 }
 0x1b2   :  { %v227_v1 = vpop.eup %226 }
 0x1b3   :  { %v229_v2 = vpop.eup %228  ;;  %v150_v3 = vadd.f32 1.0, %v227_v1 }
 0x1b4   :  { %v152_v4 = vmul.f32 %v229_v2, %v149_v0  ;;  %vm157_vm9 = vweird.f32 %v229_v2 }
 0x1b5   :  { %230 = vrcp.f32 %v150_v3  ;;  %vm158_vm11 = vmor %vm156_vm10, %vm157_vm9  ;;  %v177_v13 = vand.u32 2147483648, %v150_v3  ;;  %v175_v16 = vand.u32 2147483647, %v150_v3  ;;  %vm171_vm14 = vweird.f32 %v150_v3 }
 0x1b6   :  { %v153_v5 = vsub.f32 1.0, %v152_v4 }
 0x1b7   :  { %v178_v20 = vor.u32 1.1754944e-38, %v177_v13  ;;  %vm176_vm0 = vcmp.eq.f32.partialorder %v175_v16, 8.507059e+37 }
 0x1b8   :  { %v154_v6 = vmul.f32 %v229_v2, %v153_v5 }
 0x1ba   :  { %v155_v8 = vadd.f32 %v229_v2, %v154_v6 }
 0x1bb   :  { %v231_v7 = vpop.eup %230 }
 0x1bc   :  { %v167_v9 = vmul.f32 %v231_v7, %v150_v3  ;;  %v159_v14 = vsel %vm158_vm11, %v229_v2, %v155_v8  ;;  %vm172_vm12 = vweird.f32 %v231_v7 }
 0x1bd   :  { %v164_v19 = vsel %vm161_vm13, %v163_v17, %v159_v14  ;;  %vm173_vm15 = vmor %vm171_vm14, %vm172_vm12 }
 0x1be   :  { %v168_v12 = vsub.f32 1.0, %v167_v9  ;;  %v181_v23 = vmul.f32 %v164_v19, %v137_v56 }
 0x1c0   :  { %v169_v15 = vmul.f32 %v231_v7, %v168_v12 }
 0x1c2   :  { %v170_v18 = vadd.f32 %v231_v7, %v169_v15 }
 0x1c4   :  { %v174_v21 = vsel %vm173_vm15, %v231_v7, %v170_v18 }
 0x1c5   :  { %v179_v22 = vsel %vm176_vm0, %v178_v20, %v174_v21 }
 0x1c6   :  { %v182_v24 = vmul.f32 %v179_v22, %v139_v60 }
 0x1c8   :  { %v212_v25 = vpack.c.bf16 %v182_v24, %v181_v23 }
 0x1ca   :  { %213 = vst [vmem:[%s297_s5] sm:$0xff] %v212_v25  }

// kernel: clip_img_feat.18
= control target key start
LH: loop header
LB: loop body
LE: loop exit
PB: predicated region body
PF: predicated region fallthrough
CT: control target
= control target key end

     0   :  { %vm111_vm0 = vcmask 261120   ;;  %s231_s1 = inlined_call_operand.vmem [shape: bf16[128,32], index: 1, kind: input, shape index: {}]   ;;  %s232_s2 = inlined_call_operand.vmem [shape: f32[1,32], index: 2, kind: input, shape index: {}]   ;;  %s233_s0 = inlined_call_operand.vmem [shape: bf16[16,128], index: 0, kind: input, shape index: {}]   ;;  %s234_s3 = inlined_call_operand.vmem [shape: f32[16,32], index: 3, kind: input, shape index: {}]   ;;  %s235_s4 = inlined_call_operand.vmem [shape: f32[16,32], index: 4, kind: output, shape index: {}]  }
   0x1   :  { %v162_v0 = vld [vmem:[%s231_s1 + $0x38] sm:$0xff]  ;;  %v161_v1 = vld [vmem:[%s231_s1 + $0x30] sm:$0xff]  ;;  %v160_v2 = vld [vmem:[%s231_s1 + $0x28] sm:$0xff] }
   0x2   :  { %93 = vmatpush.bf16.msra.mxu0 %v162_v0  ;;  %v159_v3 = vld [vmem:[%s231_s1 + $0x20] sm:$0xff]  ;;  %v158_v4 = vld [vmem:[%s231_s1 + $0x18] sm:$0xff]  ;;  %v157_v5 = vld [vmem:[%s231_s1 + $0x10] sm:$0xff] }
   0x3   :  { %v156_v6 = vld [vmem:[%s231_s1 + $0x8] sm:$0xff]  ;;  %v155_v7 = vld [vmem:[%s231_s1] sm:$0xff] }
   0x4   :  { %v154_v8 = vld [vmem:[%s233_s0] sm:$0xff]  ;;  %v108_v15 = vld [vmem:[%s234_s3 + $0x8] sm:$0xff] }
   0x5   :  { %v163_v9 = vld [vmem:[%s232_s2] ss:$0 sm:$0xff] }
   0x6   :  { %94 = vmatpush.bf16.msra.mxu0 %v161_v1  ;;  %v107_v11 = vld [vmem:[%s234_s3] sm:$0xff] }
   0xa   :  { %95 = vmatpush.bf16.msra.mxu0 %v160_v2 }
   0xe   :  { %96 = vmatpush.bf16.msra.mxu0 %v159_v3 }
  0x12   :  { %97 = vmatpush.bf16.msra.mxu0 %v158_v4 }
  0x16   :  { %98 = vmatpush.bf16.msra.mxu0 %v157_v5 }
  0x1a   :  { %99 = vmatpush.bf16.msra.mxu0 %v156_v6 }
  0x1e   :  { %100 = vmatpush.bf16.msra.mxu0 %v155_v7 }
  0x21   :  { %101 = vmatmul.bf16.vlgmr.msra.gmra.mxu0 %v154_v8 }
  0x9e   :  { %v102_v10 = vpop.f32.mrf.mxu0 }
  0x9f   :  { %v103_v12 = vadd.f32 %v163_v9, %v102_v10 }
  0xa1   :  { %v109_v13 = vadd.f32 %v107_v11, %v103_v12 }
  0xa3   :  { %112 = vst.msk [vmem:[%s235_s4] sm:$0xff] %vm111_vm0, %v109_v13 }
  0xa6   :  { %v104_v14 = vpop.f32.mrf.mxu0 }
  0xa7   :  { %v105_v16 = vadd.f32 %v163_v9, %v104_v14 }
  0xa9   :  { %v110_v17 = vadd.f32 %v108_v15, %v105_v16 }
  0xab   :  { %113 = vst.msk [vmem:[%s235_s4 + $0x8] sm:$0xff] %vm111_vm0, %v110_v17 }

</bundles_post_ra>
